<compile_context>
chip_gen: v7x
topology: tpu7x:2x2x1
jax: 0.10.0
libtpu: 0.0.40
codegen_flags: <defaults>
</compile_context>

<pallas_src>
import functools

import jax
import jax.numpy as jnp
from jax.experimental import pallas as pl
from jax.experimental.pallas import tpu as pltpu


# ----------------------------- fused Pallas kernel -----------------------------

def _make_fused_kernel(n_enc, n_agents, hp, comm_rounds):
    """Build the fused CommNet forward kernel for a fixed layer structure."""
    n_q = 3  # Q_Net is always MLP(H, (1024, 512, actions), None, False)

    def kernel(*refs):
        x_ref, m_ref = refs[0], refs[1]
        rest = refs[2:]
        enc_refs = [(rest[2 * i], rest[2 * i + 1]) for i in range(n_enc)]
        rest = rest[2 * n_enc:]
        wih_ref, wsum_ref, lb_ref = rest[0], rest[1], rest[2]
        rest = rest[3:]
        q_refs = [(rest[2 * i], rest[2 * i + 1]) for i in range(n_q)]
        out_ref = rest[2 * n_q]

        Hp = hp
        cd = wih_ref.dtype  # MXU compute dtype (bf16); accumulation stays f32

        def dense(v, w_ref, b_ref):
            return jnp.dot(v.astype(cd), w_ref[...],
                           preferred_element_type=jnp.float32) + b_ref[...]

        # --- encoder MLP: ReLU on every layer (activation_on_output=True) ---
        h = x_ref[...]
        for w_ref, b_ref in enc_refs:
            h = jnp.maximum(dense(h, w_ref, b_ref), 0.0)

        lb = lb_ref[...]  # fused bih+bhh, gate-padded, f32

        # --- first LSTM step: state is None -> zero h/c; skip h@Whh and f*c ---
        gates = jnp.dot(h.astype(cd), wih_ref[...],
                        preferred_element_type=jnp.float32) + lb
        i_g = jax.nn.sigmoid(gates[:, 0:Hp])
        g_g = jnp.tanh(gates[:, 2 * Hp:3 * Hp])
        o_g = jax.nn.sigmoid(gates[:, 3 * Hp:4 * Hp])
        c_st = i_g * g_g
        h_st = o_g * jnp.tanh(c_st)

        m = m_ref[...]  # (bt, N, N) bf16: diag zeroed, rows pre-scaled by 1/clamp(deg,1)
        bt = m.shape[0]
        rows = bt * n_agents

        # --- communication rounds (static, small count -> unrolled; switch to
        #     lax.fori_loop(..., unroll=True) if comm_rounds grows large) ---
        for _ in range(comm_rounds):
            h3 = h_st.reshape(bt, n_agents, Hp).astype(cd)
            c_comm = jnp.einsum("bij,bjh->bih", m, h3,
                                preferred_element_type=jnp.float32)
            h_agg = h_st + c_comm.reshape(rows, Hp)
            # torch: state[0] <- h_agg, cell carried; LSTM input == hidden == h_agg,
            # so the two LSTM matmuls collapse into one against (Wih + Whh)^T.
            gates = jnp.dot(h_agg.astype(cd), wsum_ref[...],
                            preferred_element_type=jnp.float32) + lb
            i_g = jax.nn.sigmoid(gates[:, 0:Hp])
            f_g = jax.nn.sigmoid(gates[:, Hp:2 * Hp])
            g_g = jnp.tanh(gates[:, 2 * Hp:3 * Hp])
            o_g = jax.nn.sigmoid(gates[:, 3 * Hp:4 * Hp])
            c_st = f_g * c_st + i_g * g_g
            h_st = o_g * jnp.tanh(c_st)

        # --- Q-net head: three Linear layers, no activation ---
        q = h_st
        for w_ref, b_ref in q_refs:
            q = dense(q, w_ref, b_ref)
        out_ref[...] = q.astype(out_ref.dtype)  # lane-dense (rows, 128) store

    return kernel


# ----------------------------- parameter preparation -----------------------------

def init_params(key, in_features, mlp_units, num_actions):
    """Torch-convention parameters: Linear weight (out, in), bias (out,)."""
    keys = iter(jax.random.split(key, 64))

    def lin(kin, kout):
        s = 1.0 / (kin ** 0.5)
        w = jax.random.uniform(next(keys), (kout, kin), jnp.float32, -s, s)
        b = jax.random.uniform(next(keys), (kout,), jnp.float32, -s, s)
        return w, b

    params = {}
    enc, prev = [], in_features
    for u in mlp_units:
        enc.append(lin(prev, u))
        prev = u
    params["encoder"] = enc
    H = prev

    s = 1.0 / (H ** 0.5)
    params["lstm"] = dict(
        wih=jax.random.uniform(next(keys), (4 * H, H), jnp.float32, -s, s),
        whh=jax.random.uniform(next(keys), (4 * H, H), jnp.float32, -s, s),
        bih=jax.random.uniform(next(keys), (4 * H,), jnp.float32, -s, s),
        bhh=jax.random.uniform(next(keys), (4 * H,), jnp.float32, -s, s),
    )

    qn, prev = [], H
    for u in (1024, 512, num_actions):  # Q_Net: MLP(H, (1024, 512, actions), None, False)
        qn.append(lin(prev, u))
        prev = u
    params["qnet"] = qn
    return params


def prepare_params(params, matmul_dtype=jnp.bfloat16, lane=128):
    """One-time layout plumbing:
      * transpose Linear weights to (in, out), lane-pad every layer width to a
        multiple of 128 with zeros (zero pads are semantically transparent here),
      * per-gate pad the LSTM weights/bias so each gate occupies a 128-aligned block,
      * fuse bih+bhh and precompute (Wih + Whh)^T in f32, cast matmul weights to the
        MXU dtype once (biases stay f32)."""

    def rup(n):
        return ((n + lane - 1) // lane) * lane

    def pad_linear(w, b, in_pad, out_pad):
        w = jnp.asarray(w, jnp.float32)          # torch (out, in)
        kout, kin = w.shape
        wt = jnp.zeros((in_pad, out_pad), jnp.float32).at[:kin, :kout].set(w.T)
        bb = jnp.zeros((1, out_pad), jnp.float32).at[0, :kout].set(
            jnp.asarray(b, jnp.float32))
        return wt.astype(matmul_dtype), bb

    # encoder chain (input feature dim stays unpadded; x ships full-width)
    enc = []
    prev_pad = params["encoder"][0][0].shape[1]
    for (w, b) in params["encoder"]:
        out_pad = rup(w.shape[0])
        enc.append(pad_linear(w, b, prev_pad, out_pad))
        prev_pad = out_pad
    H = params["encoder"][-1][0].shape[0]
    Hp = prev_pad

    # LSTM: fuse biases, precompute Wih+Whh in f32, gate-pad to 128-lane blocks
    lp = params["lstm"]
    wih = jnp.asarray(lp["wih"], jnp.float32)
    whh = jnp.asarray(lp["whh"], jnp.float32)
    wsum = wih + whh
    bias = jnp.asarray(lp["bih"], jnp.float32) + jnp.asarray(lp["bhh"], jnp.float32)

    def pad_gates(w_t):  # w_t: (H, 4H) -> (Hp, 4Hp), gate k -> cols [k*Hp, k*Hp+H)
        out = jnp.zeros((Hp, 4 * Hp), jnp.float32)
        for k in range(4):
            out = out.at[:H, k * Hp:k * Hp + H].set(w_t[:, k * H:(k + 1) * H])
        return out

    wih_p = pad_gates(wih.T).astype(matmul_dtype)
    wsum_p = pad_gates(wsum.T).astype(matmul_dtype)
    bias_p = jnp.zeros((1, 4 * Hp), jnp.float32)
    for k in range(4):
        bias_p = bias_p.at[0, k * Hp:k * Hp + H].set(bias[k * H:(k + 1) * H])

    # Q-net chain (input rows padded H->Hp; last layer lane-padded to 128)
    qn, prev_pad = [], Hp
    for (w, b) in params["qnet"]:
        out_pad = rup(w.shape[0])
        qn.append(pad_linear(w, b, prev_pad, out_pad))
        prev_pad = out_pad

    return {"enc": enc, "wih": wih_p, "wsum": wsum_p, "bias": bias_p, "qnet": qn}


# ----------------------------- forward (single pallas_call) -----------------------------

@functools.partial(jax.jit,
                   static_argnames=("comm_rounds", "num_actions", "batch_tile"))
def commnet_forward(prep, x, mask, comm_rounds, num_actions, batch_tile=None):
    B, N, F = x.shape
    rows = B * N
    Hp = prep["wih"].shape[0]
    out_pad = prep["qnet"][-1][0].shape[1]

    # Row tile = whole batches.  Target ~256 rows/tile (v6e/v7x MXU); fall back to one
    # tile if the sublane alignment of the row axis can't be kept.
    if batch_tile is None:
        bt = 1
        for d in range(1, B + 1):
            if B % d == 0 and d * N <= 256:
                bt = d
        if (bt * N) % 8 != 0:
            bt = B
    else:
        bt = int(batch_tile)
    assert B % bt == 0, "batch_tile must divide the batch size"
    assert (bt * N) % 8 == 0 or bt == B, \
        "pick batch_tile so batch_tile * n_agents is a multiple of 8"
    rt = bt * N
    grid = (B // bt,)

    # bf16 inputs: halves DMA bytes; kernel would cast before the MXU anyway.
    x2 = x.reshape(rows, F).astype(jnp.bfloat16)

    # Mask preprocessing (layout plumbing): zero the diagonal and fold the
    # 1/clamp(row-sum, 1) normalizer into the mask (in f32, then cast once).
    m = mask.astype(jnp.float32) * (1.0 - jnp.eye(N, dtype=jnp.float32))[None]
    inv = 1.0 / jnp.maximum(m.sum(-1, keepdims=True), 1.0)
    m_scaled = (m * inv).astype(jnp.bfloat16)  # (B, N, N)

    flat = [x2, m_scaled]
    for w, b in prep["enc"]:
        flat += [w, b]
    flat += [prep["wih"], prep["wsum"], prep["bias"]]
    for w, b in prep["qnet"]:
        flat += [w, b]

    def const_spec(arr):  # weights: same block every grid step -> DMA'd once, resident
        return pl.BlockSpec(arr.shape, lambda i: (0,) * arr.ndim)

    in_specs = [
        pl.BlockSpec((rt, F), lambda i: (i, 0)),
        pl.BlockSpec((bt, N, N), lambda i: (i, 0, 0)),
    ]
    for arr in flat[2:]:
        in_specs.append(const_spec(arr))

    kernel = _make_fused_kernel(n_enc=len(prep["enc"]), n_agents=N, hp=Hp,
                                comm_rounds=comm_rounds)

    q_pad = pl.pallas_call(
        kernel,
        out_shape=jax.ShapeDtypeStruct((rows, out_pad), jnp.float32),
        grid=grid,
        in_specs=in_specs,
        out_specs=pl.BlockSpec((rt, out_pad), lambda i: (i, 0)),
        compiler_params=pltpu.CompilerParams(
            dimension_semantics=("parallel",),      # megacore / 2nd TC on v7x
            vmem_limit_bytes=48 * 1024 * 1024,      # stays within v7x's 64 MiB VMEM
        ),
    )(*flat)

    return q_pad[:, :num_actions].reshape(B, N, num_actions)


# ----------------------------- pure-JAX reference (torch semantics) -----------------------------

def commnet_reference(params, x, mask, comm_rounds):
    B, N, F = x.shape
    h = x.reshape(B * N, F)
    for w, b in params["encoder"]:
        h = jnp.maximum(h @ w.T + b, 0.0)
    H = h.shape[-1]
    lp = params["lstm"]

    def lstm(x_in, h_prev, c_prev):
        gates = x_in @ lp["wih"].T + lp["bih"] + h_prev @ lp["whh"].T + lp["bhh"]
        i = jax.nn.sigmoid(gates[:, 0:H])
        f = jax.nn.sigmoid(gates[:, H:2 * H])
        g = jnp.tanh(gates[:, 2 * H:3 * H])
        o = jax.nn.sigmoid(gates[:, 3 * H:4 * H])
        c = f * c_prev + i * g
        return o * jnp.tanh(c), c

    z = jnp.zeros((B * N, H), jnp.float32)
    h_st, c_st = lstm(h, z, z)

    m = mask.astype(jnp.float32) * (1.0 - jnp.eye(N, dtype=jnp.float32))[None]
    denom = jnp.maximum(m.sum(-1, keepdims=True), 1.0)
    for _ in range(comm_rounds):
        h3 = h_st.reshape(B, N, H)
        c_comm = jnp.einsum("bij,bjh->bih", m, h3) / denom
        h_agg = (h3 + c_comm).reshape(B * N, H)
        h_st, c_st = lstm(h_agg, h_agg, c_st)

    q = h_st
    for w, b in params["qnet"]:
        q = q @ w.T + b
    return q.reshape(B, N, -1)


# ----------------------------- demo -----------------------------

if __name__ == "__main__":
    B, N, F = 2, 16, 16          # batch, n_agents, in_features
    mlp_units = (64, 32)         # encoder MLP -> LSTM hidden size 32
    num_actions = 5
    comm_rounds = 2

    key = jax.random.PRNGKey(0)
    kx, km, kp = jax.random.split(key, 3)
    x = jax.random.normal(kx, (B, N, F), jnp.float32)
    mask = jax.random.bernoulli(km, 0.7, (B, N, N)).astype(jnp.float32)

    params = init_params(kp, F, mlp_units, num_actions)
    prep = prepare_params(params)

    # batch_tile=1 exercises the batch grid (grid=(2,)); production sizing picks
    # whole-batch tiles of ~256 rows automatically when batch_tile is None.
    q = commnet_forward(prep, x, mask, comm_rounds=comm_rounds,
                        num_actions=num_actions, batch_tile=1)
    q = jax.block_until_ready(q)

    q_ref = commnet_reference(params, x, mask, comm_rounds)
    assert q.shape == (B, N, num_actions)
    assert bool(jnp.all(jnp.isfinite(q)))
    assert bool(jnp.allclose(q, q_ref, atol=3e-2, rtol=3e-2)), \
        f"max abs diff {float(jnp.max(jnp.abs(q - q_ref)))}"
    print("KERNEL_OK")
</pallas_src>

<mosaic_0001>
module attributes {stable_mosaic.version = 11 : i64} {
  func.func @kernel(%arg0: i32, %arg1: memref<16x16xbf16, #tpu.memory_space<vmem>>, %arg2: memref<1x16x16xbf16, #tpu.memory_space<vmem>>, %arg3: memref<16x128xbf16, #tpu.memory_space<vmem>>, %arg4: memref<1x128xf32, #tpu.memory_space<vmem>>, %arg5: memref<128x128xbf16, #tpu.memory_space<vmem>>, %arg6: memref<1x128xf32, #tpu.memory_space<vmem>>, %arg7: memref<128x512xbf16, #tpu.memory_space<vmem>>, %arg8: memref<128x512xbf16, #tpu.memory_space<vmem>>, %arg9: memref<1x512xf32, #tpu.memory_space<vmem>>, %arg10: memref<128x1024xbf16, #tpu.memory_space<vmem>>, %arg11: memref<1x1024xf32, #tpu.memory_space<vmem>>, %arg12: memref<1024x512xbf16, #tpu.memory_space<vmem>>, %arg13: memref<1x512xf32, #tpu.memory_space<vmem>>, %arg14: memref<512x128xbf16, #tpu.memory_space<vmem>>, %arg15: memref<1x128xf32, #tpu.memory_space<vmem>>, %arg16: memref<16x128xf32, #tpu.memory_space<vmem>>) attributes {dimension_semantics = [#tpu.dimension_semantics<parallel>], iteration_bounds = array<i64: 2>, scalar_prefetch = 0 : i64, scratch_operands = 0 : i64, tpu.core_type = #tpu.core_type<tc>, window_params = [{transform_indices = @transform_0, window_bounds = array<i64: 16, 16>}, {transform_indices = @transform_1, window_bounds = array<i64: 1, 16, 16>}, {pipeline_mode = #tpu.pipeline_mode<synchronous>, transform_indices = @transform_2, window_bounds = array<i64: 16, 128>}, {pipeline_mode = #tpu.pipeline_mode<synchronous>, transform_indices = @transform_3, window_bounds = array<i64: 1, 128>}, {pipeline_mode = #tpu.pipeline_mode<synchronous>, transform_indices = @transform_4, window_bounds = array<i64: 128, 128>}, {pipeline_mode = #tpu.pipeline_mode<synchronous>, transform_indices = @transform_5, window_bounds = array<i64: 1, 128>}, {pipeline_mode = #tpu.pipeline_mode<synchronous>, transform_indices = @transform_6, window_bounds = array<i64: 128, 512>}, {pipeline_mode = #tpu.pipeline_mode<synchronous>, transform_indices = @transform_7, window_bounds = array<i64: 128, 512>}, {pipeline_mode = #tpu.pipeline_mode<synchronous>, transform_indices = @transform_8, window_bounds = array<i64: 1, 512>}, {pipeline_mode = #tpu.pipeline_mode<synchronous>, transform_indices = @transform_9, window_bounds = array<i64: 128, 1024>}, {pipeline_mode = #tpu.pipeline_mode<synchronous>, transform_indices = @transform_10, window_bounds = array<i64: 1, 1024>}, {pipeline_mode = #tpu.pipeline_mode<synchronous>, transform_indices = @transform_11, window_bounds = array<i64: 1024, 512>}, {pipeline_mode = #tpu.pipeline_mode<synchronous>, transform_indices = @transform_12, window_bounds = array<i64: 1, 512>}, {pipeline_mode = #tpu.pipeline_mode<synchronous>, transform_indices = @transform_13, window_bounds = array<i64: 512, 128>}, {pipeline_mode = #tpu.pipeline_mode<synchronous>, transform_indices = @transform_14, window_bounds = array<i64: 1, 128>}, {transform_indices = @transform_15, window_bounds = array<i64: 16, 128>}]} {
    %c0 = arith.constant 0 : index
    %c0_0 = arith.constant 0 : index
    %0 = vector.load %arg1[%c0, %c0_0] : memref<16x16xbf16, #tpu.memory_space<vmem>>, vector<16x16xbf16>
    %c0_1 = arith.constant 0 : index
    %c0_2 = arith.constant 0 : index
    %1 = vector.load %arg3[%c0_1, %c0_2] : memref<16x128xbf16, #tpu.memory_space<vmem>>, vector<16x128xbf16>
    %cst = arith.constant dense<0.000000e+00> : vector<16x128xf32>
    %2 = tpu.matmul %0, %1, %cst {dimension_numbers = #tpu.dot_dimension_numbers<[1], [0], [0], [1], [0, 0, 1, 1], [], []>} : vector<16x16xbf16>, vector<16x128xbf16>, vector<16x128xf32> -> vector<16x128xf32>
    %c0_3 = arith.constant 0 : index
    %c0_4 = arith.constant 0 : index
    %3 = vector.load %arg4[%c0_3, %c0_4] : memref<1x128xf32, #tpu.memory_space<vmem>>, vector<1x128xf32>
    %4 = vector.broadcast %3 : vector<1x128xf32> to vector<16x128xf32>
    %5 = arith.addf %2, %4 : vector<16x128xf32>
    %cst_5 = arith.constant 0.000000e+00 : f32
    %6 = vector.broadcast %cst_5 : f32 to vector<16x128xf32>
    %7 = arith.maximumf %5, %6 : vector<16x128xf32>
    %8 = arith.truncf %7 : vector<16x128xf32> to vector<16x128xbf16>
    %c0_6 = arith.constant 0 : index
    %c0_7 = arith.constant 0 : index
    %9 = vector.load %arg5[%c0_6, %c0_7] : memref<128x128xbf16, #tpu.memory_space<vmem>>, vector<128x128xbf16>
    %cst_8 = arith.constant dense<0.000000e+00> : vector<16x128xf32>
    %10 = tpu.matmul %8, %9, %cst_8 {dimension_numbers = #tpu.dot_dimension_numbers<[1], [0], [0], [1], [0, 0, 1, 1], [], []>} : vector<16x128xbf16>, vector<128x128xbf16>, vector<16x128xf32> -> vector<16x128xf32>
    %c0_9 = arith.constant 0 : index
    %c0_10 = arith.constant 0 : index
    %11 = vector.load %arg6[%c0_9, %c0_10] : memref<1x128xf32, #tpu.memory_space<vmem>>, vector<1x128xf32>
    %12 = vector.broadcast %11 : vector<1x128xf32> to vector<16x128xf32>
    %13 = arith.addf %10, %12 : vector<16x128xf32>
    %cst_11 = arith.constant 0.000000e+00 : f32
    %14 = vector.broadcast %cst_11 : f32 to vector<16x128xf32>
    %15 = arith.maximumf %13, %14 : vector<16x128xf32>
    %c0_12 = arith.constant 0 : index
    %c0_13 = arith.constant 0 : index
    %16 = vector.load %arg9[%c0_12, %c0_13] : memref<1x512xf32, #tpu.memory_space<vmem>>, vector<1x512xf32>
    %17 = arith.truncf %15 : vector<16x128xf32> to vector<16x128xbf16>
    %c0_14 = arith.constant 0 : index
    %c0_15 = arith.constant 0 : index
    %18 = vector.load %arg7[%c0_14, %c0_15] : memref<128x512xbf16, #tpu.memory_space<vmem>>, vector<128x512xbf16>
    %cst_16 = arith.constant dense<0.000000e+00> : vector<16x512xf32>
    %19 = tpu.matmul %17, %18, %cst_16 {dimension_numbers = #tpu.dot_dimension_numbers<[1], [0], [0], [1], [0, 0, 1, 1], [], []>} : vector<16x128xbf16>, vector<128x512xbf16>, vector<16x512xf32> -> vector<16x512xf32>
    %20 = vector.broadcast %16 : vector<1x512xf32> to vector<16x512xf32>
    %21 = arith.addf %19, %20 : vector<16x512xf32>
    %22 = vector.extract_strided_slice %21 {offsets = [0, 0], sizes = [16, 128], strides = [1, 1]} : vector<16x512xf32> to vector<16x128xf32>
    %23 = arith.negf %22 : vector<16x128xf32>
    %24 = math.exp %23 : vector<16x128xf32>
    %cst_17 = arith.constant 1.000000e+00 : f32
    %25 = vector.broadcast %cst_17 : f32 to vector<16x128xf32>
    %26 = arith.addf %25, %24 : vector<16x128xf32>
    %27 = arith.divf %25, %26 : vector<16x128xf32>
    %28 = vector.extract_strided_slice %21 {offsets = [0, 256], sizes = [16, 128], strides = [1, 1]} : vector<16x512xf32> to vector<16x128xf32>
    %29 = math.tanh %28 : vector<16x128xf32>
    %30 = vector.extract_strided_slice %21 {offsets = [0, 384], sizes = [16, 128], strides = [1, 1]} : vector<16x512xf32> to vector<16x128xf32>
    %31 = arith.negf %30 : vector<16x128xf32>
    %32 = math.exp %31 : vector<16x128xf32>
    %cst_18 = arith.constant 1.000000e+00 : f32
    %33 = vector.broadcast %cst_18 : f32 to vector<16x128xf32>
    %34 = arith.addf %33, %32 : vector<16x128xf32>
    %35 = arith.divf %33, %34 : vector<16x128xf32>
    %36 = arith.mulf %27, %29 : vector<16x128xf32>
    %37 = math.tanh %36 : vector<16x128xf32>
    %38 = arith.mulf %35, %37 : vector<16x128xf32>
    %c0_19 = arith.constant 0 : index
    %c0_20 = arith.constant 0 : index
    %c0_21 = arith.constant 0 : index
    %39 = vector.load %arg2[%c0_19, %c0_20, %c0_21] : memref<1x16x16xbf16, #tpu.memory_space<vmem>>, vector<1x16x16xbf16>
    %40 = vector.shape_cast %38 : vector<16x128xf32> to vector<1x16x128xf32>
    %41 = arith.truncf %40 : vector<1x16x128xf32> to vector<1x16x128xbf16>
    "tpu.trace_start"() <{level = 10 : i32, message = "bij,bjh->bih"}> : () -> ()
    %cst_22 = arith.constant dense<0.000000e+00> : vector<1x16x128xf32>
    %42 = tpu.matmul %39, %41, %cst_22 {dimension_numbers = #tpu.dot_dimension_numbers<[2], [1], [1], [2], [0, 0, 0, 1, 1, 2], [0], [0]>} : vector<1x16x16xbf16>, vector<1x16x128xbf16>, vector<1x16x128xf32> -> vector<1x16x128xf32>
    "tpu.trace_stop"() : () -> ()
    %43 = vector.shape_cast %42 : vector<1x16x128xf32> to vector<16x128xf32>
    %44 = arith.addf %38, %43 : vector<16x128xf32>
    %45 = arith.truncf %44 : vector<16x128xf32> to vector<16x128xbf16>
    %c0_23 = arith.constant 0 : index
    %c0_24 = arith.constant 0 : index
    %46 = vector.load %arg8[%c0_23, %c0_24] : memref<128x512xbf16, #tpu.memory_space<vmem>>, vector<128x512xbf16>
    %cst_25 = arith.constant dense<0.000000e+00> : vector<16x512xf32>
    %47 = tpu.matmul %45, %46, %cst_25 {dimension_numbers = #tpu.dot_dimension_numbers<[1], [0], [0], [1], [0, 0, 1, 1], [], []>} : vector<16x128xbf16>, vector<128x512xbf16>, vector<16x512xf32> -> vector<16x512xf32>
    %48 = vector.broadcast %16 : vector<1x512xf32> to vector<16x512xf32>
    %49 = arith.addf %47, %48 : vector<16x512xf32>
    %50 = vector.extract_strided_slice %49 {offsets = [0, 0], sizes = [16, 128], strides = [1, 1]} : vector<16x512xf32> to vector<16x128xf32>
    %51 = arith.negf %50 : vector<16x128xf32>
    %52 = math.exp %51 : vector<16x128xf32>
    %cst_26 = arith.constant 1.000000e+00 : f32
    %53 = vector.broadcast %cst_26 : f32 to vector<16x128xf32>
    %54 = arith.addf %53, %52 : vector<16x128xf32>
    %55 = arith.divf %53, %54 : vector<16x128xf32>
    %56 = vector.extract_strided_slice %49 {offsets = [0, 128], sizes = [16, 128], strides = [1, 1]} : vector<16x512xf32> to vector<16x128xf32>
    %57 = arith.negf %56 : vector<16x128xf32>
    %58 = math.exp %57 : vector<16x128xf32>
    %cst_27 = arith.constant 1.000000e+00 : f32
    %59 = vector.broadcast %cst_27 : f32 to vector<16x128xf32>
    %60 = arith.addf %59, %58 : vector<16x128xf32>
    %61 = arith.divf %59, %60 : vector<16x128xf32>
    %62 = vector.extract_strided_slice %49 {offsets = [0, 256], sizes = [16, 128], strides = [1, 1]} : vector<16x512xf32> to vector<16x128xf32>
    %63 = math.tanh %62 : vector<16x128xf32>
    %64 = vector.extract_strided_slice %49 {offsets = [0, 384], sizes = [16, 128], strides = [1, 1]} : vector<16x512xf32> to vector<16x128xf32>
    %65 = arith.negf %64 : vector<16x128xf32>
    %66 = math.exp %65 : vector<16x128xf32>
    %cst_28 = arith.constant 1.000000e+00 : f32
    %67 = vector.broadcast %cst_28 : f32 to vector<16x128xf32>
    %68 = arith.addf %67, %66 : vector<16x128xf32>
    %69 = arith.divf %67, %68 : vector<16x128xf32>
    %70 = arith.mulf %61, %36 : vector<16x128xf32>
    %71 = arith.mulf %55, %63 : vector<16x128xf32>
    %72 = arith.addf %70, %71 : vector<16x128xf32>
    %73 = math.tanh %72 : vector<16x128xf32>
    %74 = arith.mulf %69, %73 : vector<16x128xf32>
    %75 = vector.shape_cast %74 : vector<16x128xf32> to vector<1x16x128xf32>
    %76 = arith.truncf %75 : vector<1x16x128xf32> to vector<1x16x128xbf16>
    "tpu.trace_start"() <{level = 10 : i32, message = "bij,bjh->bih"}> : () -> ()
    %cst_29 = arith.constant dense<0.000000e+00> : vector<1x16x128xf32>
    %77 = tpu.matmul %39, %76, %cst_29 {dimension_numbers = #tpu.dot_dimension_numbers<[2], [1], [1], [2], [0, 0, 0, 1, 1, 2], [0], [0]>} : vector<1x16x16xbf16>, vector<1x16x128xbf16>, vector<1x16x128xf32> -> vector<1x16x128xf32>
    "tpu.trace_stop"() : () -> ()
    %78 = vector.shape_cast %77 : vector<1x16x128xf32> to vector<16x128xf32>
    %79 = arith.addf %74, %78 : vector<16x128xf32>
    %80 = arith.truncf %79 : vector<16x128xf32> to vector<16x128xbf16>
    %c0_30 = arith.constant 0 : index
    %c0_31 = arith.constant 0 : index
    %81 = vector.load %arg8[%c0_30, %c0_31] : memref<128x512xbf16, #tpu.memory_space<vmem>>, vector<128x512xbf16>
    %cst_32 = arith.constant dense<0.000000e+00> : vector<16x512xf32>
    %82 = tpu.matmul %80, %81, %cst_32 {dimension_numbers = #tpu.dot_dimension_numbers<[1], [0], [0], [1], [0, 0, 1, 1], [], []>} : vector<16x128xbf16>, vector<128x512xbf16>, vector<16x512xf32> -> vector<16x512xf32>
    %83 = vector.broadcast %16 : vector<1x512xf32> to vector<16x512xf32>
    %84 = arith.addf %82, %83 : vector<16x512xf32>
    %85 = vector.extract_strided_slice %84 {offsets = [0, 0], sizes = [16, 128], strides = [1, 1]} : vector<16x512xf32> to vector<16x128xf32>
    %86 = arith.negf %85 : vector<16x128xf32>
    %87 = math.exp %86 : vector<16x128xf32>
    %cst_33 = arith.constant 1.000000e+00 : f32
    %88 = vector.broadcast %cst_33 : f32 to vector<16x128xf32>
    %89 = arith.addf %88, %87 : vector<16x128xf32>
    %90 = arith.divf %88, %89 : vector<16x128xf32>
    %91 = vector.extract_strided_slice %84 {offsets = [0, 128], sizes = [16, 128], strides = [1, 1]} : vector<16x512xf32> to vector<16x128xf32>
    %92 = arith.negf %91 : vector<16x128xf32>
    %93 = math.exp %92 : vector<16x128xf32>
    %cst_34 = arith.constant 1.000000e+00 : f32
    %94 = vector.broadcast %cst_34 : f32 to vector<16x128xf32>
    %95 = arith.addf %94, %93 : vector<16x128xf32>
    %96 = arith.divf %94, %95 : vector<16x128xf32>
    %97 = vector.extract_strided_slice %84 {offsets = [0, 256], sizes = [16, 128], strides = [1, 1]} : vector<16x512xf32> to vector<16x128xf32>
    %98 = math.tanh %97 : vector<16x128xf32>
    %99 = vector.extract_strided_slice %84 {offsets = [0, 384], sizes = [16, 128], strides = [1, 1]} : vector<16x512xf32> to vector<16x128xf32>
    %100 = arith.negf %99 : vector<16x128xf32>
    %101 = math.exp %100 : vector<16x128xf32>
    %cst_35 = arith.constant 1.000000e+00 : f32
    %102 = vector.broadcast %cst_35 : f32 to vector<16x128xf32>
    %103 = arith.addf %102, %101 : vector<16x128xf32>
    %104 = arith.divf %102, %103 : vector<16x128xf32>
    %105 = arith.mulf %96, %72 : vector<16x128xf32>
    %106 = arith.mulf %90, %98 : vector<16x128xf32>
    %107 = arith.addf %105, %106 : vector<16x128xf32>
    %108 = math.tanh %107 : vector<16x128xf32>
    %109 = arith.mulf %104, %108 : vector<16x128xf32>
    %110 = arith.truncf %109 : vector<16x128xf32> to vector<16x128xbf16>
    %c0_36 = arith.constant 0 : index
    %c0_37 = arith.constant 0 : index
    %111 = vector.load %arg10[%c0_36, %c0_37] : memref<128x1024xbf16, #tpu.memory_space<vmem>>, vector<128x1024xbf16>
    %cst_38 = arith.constant dense<0.000000e+00> : vector<16x1024xf32>
    %112 = tpu.matmul %110, %111, %cst_38 {dimension_numbers = #tpu.dot_dimension_numbers<[1], [0], [0], [1], [0, 0, 1, 1], [], []>} : vector<16x128xbf16>, vector<128x1024xbf16>, vector<16x1024xf32> -> vector<16x1024xf32>
    %c0_39 = arith.constant 0 : index
    %c0_40 = arith.constant 0 : index
    %113 = vector.load %arg11[%c0_39, %c0_40] : memref<1x1024xf32, #tpu.memory_space<vmem>>, vector<1x1024xf32>
    %114 = vector.broadcast %113 : vector<1x1024xf32> to vector<16x1024xf32>
    %115 = arith.addf %112, %114 : vector<16x1024xf32>
    %116 = arith.truncf %115 : vector<16x1024xf32> to vector<16x1024xbf16>
    %c0_41 = arith.constant 0 : index
    %c0_42 = arith.constant 0 : index
    %117 = vector.load %arg12[%c0_41, %c0_42] : memref<1024x512xbf16, #tpu.memory_space<vmem>>, vector<1024x512xbf16>
    %cst_43 = arith.constant dense<0.000000e+00> : vector<16x512xf32>
    %118 = tpu.matmul %116, %117, %cst_43 {dimension_numbers = #tpu.dot_dimension_numbers<[1], [0], [0], [1], [0, 0, 1, 1], [], []>} : vector<16x1024xbf16>, vector<1024x512xbf16>, vector<16x512xf32> -> vector<16x512xf32>
    %c0_44 = arith.constant 0 : index
    %c0_45 = arith.constant 0 : index
    %119 = vector.load %arg13[%c0_44, %c0_45] : memref<1x512xf32, #tpu.memory_space<vmem>>, vector<1x512xf32>
    %120 = vector.broadcast %119 : vector<1x512xf32> to vector<16x512xf32>
    %121 = arith.addf %118, %120 : vector<16x512xf32>
    %122 = arith.truncf %121 : vector<16x512xf32> to vector<16x512xbf16>
    %c0_46 = arith.constant 0 : index
    %c0_47 = arith.constant 0 : index
    %123 = vector.load %arg14[%c0_46, %c0_47] : memref<512x128xbf16, #tpu.memory_space<vmem>>, vector<512x128xbf16>
    %cst_48 = arith.constant dense<0.000000e+00> : vector<16x128xf32>
    %124 = tpu.matmul %122, %123, %cst_48 {dimension_numbers = #tpu.dot_dimension_numbers<[1], [0], [0], [1], [0, 0, 1, 1], [], []>} : vector<16x512xbf16>, vector<512x128xbf16>, vector<16x128xf32> -> vector<16x128xf32>
    %c0_49 = arith.constant 0 : index
    %c0_50 = arith.constant 0 : index
    %125 = vector.load %arg15[%c0_49, %c0_50] : memref<1x128xf32, #tpu.memory_space<vmem>>, vector<1x128xf32>
    %126 = vector.broadcast %125 : vector<1x128xf32> to vector<16x128xf32>
    %127 = arith.addf %124, %126 : vector<16x128xf32>
    %c0_51 = arith.constant 0 : index
    %c0_52 = arith.constant 0 : index
    %128 = vector.load %arg16[%c0_51, %c0_52] : memref<16x128xf32, #tpu.memory_space<vmem>>, vector<16x128xf32>
    tpu.vector_store %arg16[%c0_51, %c0_52], %127 {strides = array<i32>} : memref<16x128xf32, #tpu.memory_space<vmem>>, vector<16x128xf32>,
    return
  }
  func.func @transform_0(%arg0: i32) -> (i32, i32) {
    %c0_i32 = arith.constant 0 : i32
    %c0_i32_0 = arith.constant 0 : i32
    return %arg0, %c0_i32 : i32, i32
  }
  func.func @transform_1(%arg0: i32) -> (i32, i32, i32) {
    %c0_i32 = arith.constant 0 : i32
    %c0_i32_0 = arith.constant 0 : i32
    %c0_i32_1 = arith.constant 0 : i32
    return %arg0, %c0_i32, %c0_i32_0 : i32, i32, i32
  }
  func.func @transform_2(%arg0: i32) -> (i32, i32) {
    %c0_i32 = arith.constant 0 : i32
    %c0_i32_0 = arith.constant 0 : i32
    %c0_i32_1 = arith.constant 0 : i32
    return %c0_i32, %c0_i32_0 : i32, i32
  }
  func.func @transform_3(%arg0: i32) -> (i32, i32) {
    %c0_i32 = arith.constant 0 : i32
    %c0_i32_0 = arith.constant 0 : i32
    %c0_i32_1 = arith.constant 0 : i32
    return %c0_i32, %c0_i32_0 : i32, i32
  }
  func.func @transform_4(%arg0: i32) -> (i32, i32) {
    %c0_i32 = arith.constant 0 : i32
    %c0_i32_0 = arith.constant 0 : i32
    %c0_i32_1 = arith.constant 0 : i32
    return %c0_i32, %c0_i32_0 : i32, i32
  }
  func.func @transform_5(%arg0: i32) -> (i32, i32) {
    %c0_i32 = arith.constant 0 : i32
    %c0_i32_0 = arith.constant 0 : i32
    %c0_i32_1 = arith.constant 0 : i32
    return %c0_i32, %c0_i32_0 : i32, i32
  }
  func.func @transform_6(%arg0: i32) -> (i32, i32) {
    %c0_i32 = arith.constant 0 : i32
    %c0_i32_0 = arith.constant 0 : i32
    %c0_i32_1 = arith.constant 0 : i32
    return %c0_i32, %c0_i32_0 : i32, i32
  }
  func.func @transform_7(%arg0: i32) -> (i32, i32) {
    %c0_i32 = arith.constant 0 : i32
    %c0_i32_0 = arith.constant 0 : i32
    %c0_i32_1 = arith.constant 0 : i32
    return %c0_i32, %c0_i32_0 : i32, i32
  }
  func.func @transform_8(%arg0: i32) -> (i32, i32) {
    %c0_i32 = arith.constant 0 : i32
    %c0_i32_0 = arith.constant 0 : i32
    %c0_i32_1 = arith.constant 0 : i32
    return %c0_i32, %c0_i32_0 : i32, i32
  }
  func.func @transform_9(%arg0: i32) -> (i32, i32) {
    %c0_i32 = arith.constant 0 : i32
    %c0_i32_0 = arith.constant 0 : i32
    %c0_i32_1 = arith.constant 0 : i32
    return %c0_i32, %c0_i32_0 : i32, i32
  }
  func.func @transform_10(%arg0: i32) -> (i32, i32) {
    %c0_i32 = arith.constant 0 : i32
    %c0_i32_0 = arith.constant 0 : i32
    %c0_i32_1 = arith.constant 0 : i32
    return %c0_i32, %c0_i32_0 : i32, i32
  }
  func.func @transform_11(%arg0: i32) -> (i32, i32) {
    %c0_i32 = arith.constant 0 : i32
    %c0_i32_0 = arith.constant 0 : i32
    %c0_i32_1 = arith.constant 0 : i32
    return %c0_i32, %c0_i32_0 : i32, i32
  }
  func.func @transform_12(%arg0: i32) -> (i32, i32) {
    %c0_i32 = arith.constant 0 : i32
    %c0_i32_0 = arith.constant 0 : i32
    %c0_i32_1 = arith.constant 0 : i32
    return %c0_i32, %c0_i32_0 : i32, i32
  }
  func.func @transform_13(%arg0: i32) -> (i32, i32) {
    %c0_i32 = arith.constant 0 : i32
    %c0_i32_0 = arith.constant 0 : i32
    %c0_i32_1 = arith.constant 0 : i32
    return %c0_i32, %c0_i32_0 : i32, i32
  }
  func.func @transform_14(%arg0: i32) -> (i32, i32) {
    %c0_i32 = arith.constant 0 : i32
    %c0_i32_0 = arith.constant 0 : i32
    %c0_i32_1 = arith.constant 0 : i32
    return %c0_i32, %c0_i32_0 : i32, i32
  }
  func.func @transform_15(%arg0: i32) -> (i32, i32) {
    %c0_i32 = arith.constant 0 : i32
    %c0_i32_0 = arith.constant 0 : i32
    return %arg0, %c0_i32 : i32, i32
  }
}

</mosaic_0001>

<bundles_post_ra>
// kernel: commnet_forward.1
= control target key start
LH: loop header
LB: loop body
LE: loop exit
PB: predicated region body
PF: predicated region fallthrough
CT: control target
= control target key end

     0   :  { %s6933_s0 = inlined_call_operand.vmem [shape: bf16[32,16], index: 0, kind: input, shape index: {}]   ;;  %s6934_s1 = inlined_call_operand.vmem [shape: bf16[2,16,16], index: 1, kind: input, shape index: {}]   ;;  %s6935_s2 = inlined_call_operand.vmem [shape: bf16[16,128], index: 2, kind: input, shape index: {}]   ;;  %s6936_s3 = inlined_call_operand.vmem [shape: f32[1,128], index: 3, kind: input, shape index: {}]   ;;  %s6937_s4 = inlined_call_operand.vmem [shape: bf16[128,128], index: 4, kind: input, shape index: {}]   ;;  %s6938_s5 = inlined_call_operand.vmem [shape: f32[1,128], index: 5, kind: input, shape index: {}]   ;;  %s6939_s6 = inlined_call_operand.hbm [shape: bf16[128,512], index: 6, kind: input, shape index: {}]   ;;  %s6940_s7 = inlined_call_operand.hbm [shape: bf16[128,512], index: 7, kind: input, shape index: {}]   ;;  %s6941_s8 = inlined_call_operand.vmem [shape: f32[1,512], index: 8, kind: input, shape index: {}]   ;;  %s6942_s9 = inlined_call_operand.hbm [shape: bf16[128,1024], index: 9, kind: input, shape index: {}]   ;;  %s6943_s10 = inlined_call_operand.vmem [shape: f32[1,1024], index: 10, kind: input, shape index: {}]   ;;  %s6944_s11 = inlined_call_operand.hbm [shape: bf16[1024,512], index: 11, kind: input, shape index: {}]   ;;  %s6945_s12 = inlined_call_operand.vmem [shape: f32[1,512], index: 12, kind: input, shape index: {}]   ;;  %s6946_s13 = inlined_call_operand.hbm [shape: bf16[512,128], index: 13, kind: input, shape index: {}]   ;;  %s6947_s14 = inlined_call_operand.vmem [shape: f32[1,128], index: 14, kind: input, shape index: {}]   ;;  %s6948_s15 = inlined_call_operand.vmem [shape: f32[32,128], index: 15, kind: output, shape index: {}]  }
   0x1   :  { %6952 = sst [smem:[#allocation14_spill]] %s6943_s10 }
   0x2   :  { %6953 = sst [smem:[#allocation15_spill]] %s6945_s12 }
   0x3   :  { %6954 = sst [smem:[#allocation16_spill]] %s6947_s14 }
   0x4   :  { %6955 = sst [smem:[#allocation17_spill]] %s6948_s15 }
   0x5   :  { %20 = vsyncpa [#allocation3], 0 }
   0x6   :  { %21 = vsyncpa [#allocation5], 0 }
   0x7   :  { %22 = vsyncpa [#allocation8], 0  ;;  %s6404_s18 = smov 0  }
   0x8 LB: > { %6956 = sst [smem:[#allocation13_spill]] %s6308_s18  ;;  %s6410_s19 = sadd.s32 4294967295, %s6308_s18   ;;  %s6308_s18 = sphi %s6404_s18, %s28_s18  }
   0x9   : > { %p4839_p0 = scmp.ge.s32.totalorder %s6308_s18, 1  ;;  %p384_p1 = scmp.lt.s32.totalorder %s6308_s18, 3 }
   0xa   : > { %p6950_p2 = scmp.eq.s32.totalorder %s6410_s19, 0  ;;  %s6310_s21 = smov [#allocation4]  }
   0xb   : > { %p6415_p3 = pnand %p4839_p0, %p384_p1  ;;  %s421_s22 = sshll.u32 %s6310_s21, 4  ;;  %s6419_s22 = int_to_ptr.vmem [resolvable:$true] %s421_s22 }
   0xc   : > { %s6311_s23 = smov [#allocation7]   ;;  %s6312_s26 = smov [#allocation2]  }
   0xd   : > { %s6957_s20 = scalar_select %p6415_p3, 1, 0 }
   0xe   : > { %p5491_p4 = pneg %p6415_p3  ;;  %s453_s24 = sshll.u32 %s6311_s23, 4  ;;  %s6423_s24 = int_to_ptr.vmem [resolvable:$true] %s453_s24 }
   0xf   : > { %s408_s27 = sshll.u32 %s6312_s26, 4  ;;  %s6313_s28 = smov [#allocation6]   ;;  %s6431_s27 = int_to_ptr.vmem [resolvable:$true] %s408_s27 }
  0x10   : > { %p6427_p5 = pnand %p6950_p2, %p5491_p4  ;;  %s6433_s29 = sshll.u32 %s6313_s28, 4  ;;  %s438_s29 = int_to_ptr.vmem [resolvable:$true] %s6433_s29 }
  0x11   : > { %s6150_s17 = scalar_lea.hbm %s6940_s7, 4096 }
  0x12   : > { %p6151_p6 = scmp.ne.s32.totalorder %s6940_s7, %s6150_s17  ;;  %p6443_p7 = pneg %p6427_p5 }
  0x13   : > { %p6157_p10 = scmp.lt.u32.totalorder %s6150_s17, %s6940_s7 }
  0x14   : > { %p6153_p8 = pnand %p6443_p7, %p6151_p6 }
  0x16   : > { %p6154_p9 = pneg %p6153_p8 }
  0x18   : > { %p6159_p11 = pnand %p6157_p10, %p6154_p9 }
  0x1a   : > { %6162 = shalt.err (!%p6159_p11)
}
  0x1b   : > { %s6163_s30 = scalar_lea.vmem %s6419_s22, 4096  ;;  %p6171_p1 = scmp.lt.s32.totalorder %s6419_s22, %s6419_s22 }
  0x1c   : > { %p6164_p12 = scmp.ne.s32.totalorder %s6419_s22, %s6163_s30  ;;  %p6172_p4 = scmp.lt.s32.totalorder %s6163_s30, %s6163_s30 }
  0x1e   : > { %p6166_p13 = pnand %p6164_p12, %p6443_p7  ;;  %p6173_p6 = por %p6172_p4, %p6171_p1 }
  0x20   : > { %p6167_p0 = pneg %p6166_p13 }
  0x22   : > { %p6174_p8 = pnand %p6173_p6, %p6167_p0 }
  0x24   : > { %6177 = shalt.err (!%p6174_p8)
}
  0x25   : > { %s6314_s16 = smov 256   ;;  %s6315_s17 = smov 16  }
  0x26   : > { %5497 = dma.hbm_to_vmem [thread:$0]  (!%p6427_p5), %s6940_s7, 4096, %s6419_s22, [#allocation5], %s6314_s16, %s6314_s16, %s6315_s17  }
  0x27   : > { %s6178_s30 = scalar_lea.hbm %s6944_s11, 32768 }
  0x28   : > { %p6179_p9 = scmp.ne.s32.totalorder %s6944_s11, %s6178_s30  ;;  %p6185_p12 = scmp.lt.u32.totalorder %s6178_s30, %s6944_s11 }
  0x2a   : > { %p6181_p10 = pnand %p6179_p9, %p6443_p7 }
  0x2c   : > { %p6182_p11 = pneg %p6181_p10 }
  0x2e   : > { %p6187_p13 = pnand %p6185_p12, %p6182_p11 }
  0x30   : > { %6190 = shalt.err (!%p6187_p13)
}
  0x31   : > { %s6191_s22 = scalar_lea.vmem %s6423_s24, 32768  ;;  %p6199_p6 = scmp.lt.s32.totalorder %s6423_s24, %s6423_s24 }
  0x32   : > { %p6192_p0 = scmp.ne.s32.totalorder %s6423_s24, %s6191_s22  ;;  %p6200_p8 = scmp.lt.s32.totalorder %s6191_s22, %s6191_s22 }
  0x34   : > { %p6194_p1 = pnand %p6192_p0, %p6443_p7  ;;  %p6201_p9 = por %p6200_p8, %p6199_p6 }
  0x36   : > { %p6195_p4 = pneg %p6194_p1 }
  0x38   : > { %p6202_p10 = pnand %p6201_p9, %p6195_p4 }
  0x3a   : > { %6205 = shalt.err (!%p6202_p10)
}
  0x3b   : > { %5503 = dma.hbm_to_vmem [thread:$0]  (!%p6427_p5), %s6944_s11, 32768, %s6423_s24, [#allocation8], %s6314_s16, %s6314_s16, %s6315_s17  }
  0x3c   : > { %s6206_s21 = scalar_lea.hbm %s6939_s6, 4096 }
  0x3d   : > { %p6207_p11 = scmp.ne.s32.totalorder %s6939_s6, %s6206_s21  ;;  %p6213_p0 = scmp.lt.u32.totalorder %s6206_s21, %s6939_s6 }
  0x3f   : > { %p6209_p12 = pnand %p6207_p11, %p6443_p7 }
  0x41   : > { %p6210_p13 = pneg %p6209_p12 }
  0x43   : > { %p6215_p1 = pnand %p6213_p0, %p6210_p13 }
  0x45   : > { %6218 = shalt.err (!%p6215_p1)
}
  0x46   : > { %s6219_s24 = scalar_lea.vmem %s6431_s27, 4096  ;;  %p6227_p9 = scmp.lt.s32.totalorder %s6431_s27, %s6431_s27 }
  0x47   : > { %p6220_p4 = scmp.ne.s32.totalorder %s6431_s27, %s6219_s24  ;;  %p6228_p10 = scmp.lt.s32.totalorder %s6219_s24, %s6219_s24 }
  0x49   : > { %p6222_p6 = pnand %p6220_p4, %p6443_p7  ;;  %p6229_p11 = por %p6228_p10, %p6227_p9 }
  0x4b   : > { %p6223_p8 = pneg %p6222_p6 }
  0x4d   : > { %p6230_p12 = pnand %p6229_p11, %p6223_p8 }
  0x4f   : > { %6233 = shalt.err (!%p6230_p12)
}
  0x50   : > { %5494 = dma.hbm_to_vmem [thread:$0]  (!%p6427_p5), %s6939_s6, 4096, %s6431_s27, [#allocation3], %s6314_s16, %s6314_s16, %s6315_s17  }
  0x51   : > { %s6234_s15 = scalar_lea.hbm %s6942_s9, 8192 }
  0x52   : > { %p6235_p13 = scmp.ne.s32.totalorder %s6942_s9, %s6234_s15  ;;  %p6241_p4 = scmp.lt.u32.totalorder %s6234_s15, %s6942_s9 }
  0x54   : > { %p6237_p0 = pnand %p6235_p13, %p6443_p7 }
  0x56   : > { %p6238_p1 = pneg %p6237_p0 }
  0x58   : > { %p6243_p6 = pnand %p6241_p4, %p6238_p1 }
  0x5a   : > { %6246 = shalt.err (!%p6243_p6)
}
  0x5b   : > { %s6247_s30 = scalar_lea.vmem %s438_s29, 8192  ;;  %p6255_p11 = scmp.lt.s32.totalorder %s438_s29, %s438_s29 }
  0x5c   : > { %p6248_p8 = scmp.ne.s32.totalorder %s438_s29, %s6247_s30  ;;  %p6256_p12 = scmp.lt.s32.totalorder %s6247_s30, %s6247_s30 }
  0x5e   : > { %p6250_p9 = pnand %p6248_p8, %p6443_p7  ;;  %p6257_p2 = por %p6256_p12, %p6255_p11 }
  0x60   : > { %p6251_p10 = pneg %p6250_p9 }
  0x62   : > { %p6258_p3 = pnand %p6257_p2, %p6251_p10 }
  0x64   : > { %6261 = shalt.err (!%p6258_p3)
}
  0x65   : > { %s6316_s27 = smov 512   ;;  %s6317_s16 = smov 32  }
  0x66   : > { %5500 = dma.hbm_to_vmem [thread:$0]  (!%p6427_p5), %s6942_s9, 8192, %s438_s29, [#allocation5], %s6316_s27, %s6316_s27, %s6317_s16  }
  0x67   : > { %s6318_s22 = smov [#allocation9]   ;;  %s6262_s15 = scalar_lea.hbm %s6946_s13, 4096 }
  0x68   : > { %s469_s10 = sshll.u32 %s6318_s22, 4  ;;  %p6263_p2 = scmp.ne.s32.totalorder %s6946_s13, %s6262_s15  ;;  %s470_s10 = int_to_ptr.vmem [resolvable:$true] %s469_s10 }
  0x69   : > { %p6269_p0 = scmp.lt.u32.totalorder %s6262_s15, %s6946_s13 }
  0x6a   : > { %p6265_p3 = pnand %p6263_p2, %p6443_p7 }
  0x6c   : > { %p6266_p13 = pneg %p6265_p3 }
  0x6e   : > { %p6271_p1 = pnand %p6269_p0, %p6266_p13 }
  0x70   : > { %6274 = shalt.err (!%p6271_p1)
}
  0x71   : > { %s6275_s29 = scalar_lea.vmem %s470_s10, 4096  ;;  %p6283_p9 = scmp.lt.s32.totalorder %s470_s10, %s470_s10 }
  0x72   : > { %p6276_p4 = scmp.ne.s32.totalorder %s470_s10, %s6275_s29  ;;  %p6284_p10 = scmp.lt.s32.totalorder %s6275_s29, %s6275_s29 }
  0x74   : > { %p6278_p6 = pnand %p6276_p4, %p6443_p7  ;;  %p6285_p11 = por %p6284_p10, %p6283_p9 }
  0x76   : > { %p6279_p8 = pneg %p6278_p6 }
  0x78   : > { %p6286_p12 = pnand %p6285_p11, %p6279_p8 }
  0x7a   : > { %6289 = shalt.err (!%p6286_p12)
}
  0x7b   : > { %s6319_s30 = smov 64   ;;  %s6320_s27 = smov 4  }
  0x7c   : > { %5506 = dma.hbm_to_vmem [thread:$0]  (!%p6427_p5), %s6946_s13, 4096, %s470_s10, [#allocation8], %s6319_s30, %s6319_s30, %s6320_s27  }
  0x7d   : > { %p6960_p2 = scmp.ne.s32.totalorder %s6957_s20, 0 }
  0x7e   : > { %p6961_p3 = scmp.eq.s32.totalorder (!%p6960_p2), %s6410_s19, 0 }
  0x7f   : > { %505 = sbr.rel (%p6960_p2) target bundleno = 2670 (0xa6e), region = 80 }
  0x86   : > { %6295 = dma.done.wait (%p6961_p3), [#allocation3], 4096   ;;  %p6962_p7 = pmov %p6961_p3 }
  0x87   : > { %p6963_p13 = pmov %p6961_p3 }
  0x88   : > { %6297 = vsyncadd (%p6962_p7), [#allocation3], 4294963200 }
  0x89   : > { %6299 = dma.done.wait (%p6963_p13), [#allocation5], 12288   ;;  %p6964_p0 = pmov %p6961_p3 }
  0x8b   : > { %6301 = vsyncadd (%p6964_p0), [#allocation5], 4294955008  ;;  %p6965_p1 = pmov %p6964_p0 }
  0x8c   : > { %p6966_p5 = pmov %p6964_p0 }
  0x8d   : > { %6303 = dma.done.wait (%p6965_p1), [#allocation8], 36864  }
  0x8e   : > { %6305 = vsyncadd (%p6966_p5), [#allocation8], 4294930432  ;;  %s4852_s18 = sshll.u32 %s6410_s19, 1  ;;  %v6321_v0 = vmov 0.0   ;;  %vm6322_vm0 = vmmov 0   ;;  %v5539_v1 = vld [vmem:[%s6935_s2] sm:$0xff]  }
  0x8f   : > { %5401 = vmatprep.subr.bf16.mxu0 %v6321_v0  ;;  %5403 = vmatprep.mubr.msk.bf16.mxu0 %vm6322_vm0, %v6321_v0  ;;  %p575_p4 = scmp.lt.s32.totalorder %s4852_s18, 3  ;;  %vm614_vm1 = vcmask 130048   ;;  %v5541_v3 = vld [vmem:[%s6937_s4] sm:$0xff]   ;;  %v5542_v4 = vld [vmem:[%s6937_s4 + $0x8] sm:$0xff]   ;;  %v5543_v5 = vld [vmem:[%s6937_s4 + $0x10] sm:$0xff]   ;;  %v6323_v53 = vmov 0  }
  0x90   : > { %5407 = vmatprep.subr.bf16.mxu1 %v6321_v0  ;;  %5423 = vmatprep.mubr.msk.bf16.mxu1 %vm6322_vm0, %v6321_v0  ;;  %v5544_v6 = vld [vmem:[%s6937_s4 + $0x18] sm:$0xff]   ;;  %v5545_v7 = vld [vmem:[%s6937_s4 + $0x20] sm:$0xff]   ;;  %v5546_v8 = vld [vmem:[%s6937_s4 + $0x28] sm:$0xff]   ;;  %p580_p6 = scmp.lt.s32.totalorder %s6410_s19, 1  ;;  %s6967_s17 = sld [smem:[#allocation14_spill]] }
  0x91   : > { %s6973_s18 = smov (!%p575_p4, %s4852_s18), 3  ;;  %5402 = vmatpush3.bf16.msra.mxu0 %v5539_v1  ;;  %5408 = vmatpush3.bf16.msra.mxu1 %v5541_v3  ;;  %v5547_v9 = vld [vmem:[%s6937_s4 + $0x30] sm:$0xff]   ;;  %v5548_v10 = vld [vmem:[%s6937_s4 + $0x38] sm:$0xff]   ;;  %v4858_v24 = vld [vmem:[%s6936_s3] ss:$0 sm:$0xff]  ;;  %s6968_s24 = sld [smem:[#allocation15_spill]] }
  0x92   : > { %s4853_s20 = sshll.u32 %s6973_s18, 2  ;;  %5409 = vmatprep.subr.bf16.mxu1 %v6321_v0  ;;  %v5549_v11 = vld [vmem:[#allocation2] ss:$16 sps:$4 sm:$0xff]   ;;  %v5551_v12 = vld [vmem:[#allocation2 + $0x4] ss:$16 sps:$4 sm:$0xff]   ;;  %s6975_s19 = smov (!%p580_p6, %s6410_s19), 1 }
  0x93   : > { %s578_s22 = scalar_lea.vmem %s6933_s0, %s4853_s20  ;;  %v5554_v13 = vld [vmem:[#allocation2 + $0xc] ss:$16 sps:$4 sm:$0xff]   ;;  %v5557_v14 = vld [vmem:[#allocation2 + $0x24] ss:$16 sps:$4 sm:$0xff]   ;;  %991 = vmatprep.subr.bf16.mxu0 %v5551_v12  ;;  %v5555_v15 = vld [vmem:[#allocation2 + $0x20] ss:$16 sps:$4 sm:$0xff]  }
  0x94   : > { %v5540_v2 = vld [vmem:[%s578_s22] sm:$0xff]   ;;  %v5552_v33 = vld [vmem:[#allocation2 + $0x8] ss:$16 sps:$4 sm:$0xff]   ;;  %v5560_v35 = vld [vmem:[#allocation2 + $0x2c] ss:$16 sps:$4 sm:$0xff]   ;;  %s5341_s23 = sshll.u32 %s6975_s19, 3 }
  0x95   : > { %5404 = vmatmul.mubr.msk.bf16.vlgmr.msra.gmra.mrb[0].mxu0 %vm614_vm1, %v5540_v2  ;;  %5410 = vmatpush3.bf16.msra.mxu1 %v5542_v4  ;;  %v5563_v16 = vld [vmem:[#allocation2 + $0x44] ss:$16 sps:$4 sm:$0xff]   ;;  %v5561_v17 = vld [vmem:[#allocation2 + $0x40] ss:$16 sps:$4 sm:$0xff]   ;;  %v5558_v36 = vld [vmem:[#allocation2 + $0x28] ss:$16 sps:$4 sm:$0xff]   ;;  %s6635_s29 = scalar_lea.vmem %s6934_s1, %s5341_s23 }
  0x96   : > { %5411 = vmatprep.subr.bf16.mxu1 %v6321_v0  ;;  %992 = vmatpush1.bf16.msra.mxu0 %v5549_v11  ;;  %v5569_v18 = vld [vmem:[#allocation2 + $0x64] ss:$16 sps:$4 sm:$0xff]   ;;  %v5567_v19 = vld [vmem:[#allocation2 + $0x60] ss:$16 sps:$4 sm:$0xff]   ;;  %v5566_v37 = vld [vmem:[#allocation2 + $0x4c] ss:$16 sps:$4 sm:$0xff]  }
  0x97   : > { %993 = vmatprep.subr.bf16.mxu0 %v5557_v14  ;;  %v5575_v20 = vld [vmem:[#allocation2 + $0x84] ss:$16 sps:$4 sm:$0xff]   ;;  %v5573_v21 = vld [vmem:[#allocation2 + $0x80] ss:$16 sps:$4 sm:$0xff]   ;;  %v5564_v38 = vld [vmem:[#allocation2 + $0x48] ss:$16 sps:$4 sm:$0xff]   ;;  %1023 = vmatprep.mubr.bf16.mxu0 %v6323_v53 }
  0x98   : > { %v5581_v22 = vld [vmem:[#allocation2 + $0xa4] ss:$16 sps:$4 sm:$0xff]   ;;  %v5579_v23 = vld [vmem:[#allocation2 + $0xa0] ss:$16 sps:$4 sm:$0xff]   ;;  %v5572_v39 = vld [vmem:[#allocation2 + $0x6c] ss:$16 sps:$4 sm:$0xff]  }
  0x99   : > { %5412 = vmatpush3.bf16.msra.mxu1 %v5543_v5  ;;  %v5570_v40 = vld [vmem:[#allocation2 + $0x68] ss:$16 sps:$4 sm:$0xff]   ;;  %v5578_v41 = vld [vmem:[#allocation2 + $0x8c] ss:$16 sps:$4 sm:$0xff]   ;;  %v5587_v45 = vld [vmem:[#allocation2 + $0xc4] ss:$16 sps:$4 sm:$0xff]  }
  0x9a   : > { %5413 = vmatprep.subr.bf16.mxu1 %v6321_v0  ;;  %994 = vmatpush1.bf16.msra.mxu0 %v5555_v15  ;;  %v5576_v42 = vld [vmem:[#allocation2 + $0x88] ss:$16 sps:$4 sm:$0xff]   ;;  %v5584_v43 = vld [vmem:[#allocation2 + $0xac] ss:$16 sps:$4 sm:$0xff]   ;;  %v5585_v47 = vld [vmem:[#allocation2 + $0xc0] ss:$16 sps:$4 sm:$0xff]   ;;  %v811_v15 = vlaneseq }
  0x9b   : > { %995 = vmatprep.subr.bf16.mxu0 %v5563_v16  ;;  %v5582_v44 = vld [vmem:[#allocation2 + $0xa8] ss:$16 sps:$4 sm:$0xff]   ;;  %v5590_v46 = vld [vmem:[#allocation2 + $0xcc] ss:$16 sps:$4 sm:$0xff]   ;;  %v5593_v49 = vld [vmem:[#allocation2 + $0xe4] ss:$16 sps:$4 sm:$0xff]  }
  0x9c   : > { %v5588_v48 = vld [vmem:[#allocation2 + $0xc8] ss:$16 sps:$4 sm:$0xff]   ;;  %v5596_v50 = vld [vmem:[#allocation2 + $0xec] ss:$16 sps:$4 sm:$0xff]   ;;  %v5591_v51 = vld [vmem:[#allocation2 + $0xe0] ss:$16 sps:$4 sm:$0xff]  }
  0x9d   : > { %5414 = vmatpush3.bf16.msra.mxu1 %v5544_v6  ;;  %v5594_v52 = vld [vmem:[#allocation2 + $0xe8] ss:$16 sps:$4 sm:$0xff]   ;;  %v4862_v54 = vld [vmem:[%s6938_s5] ss:$0 sm:$0xff]  ;;  %v6639_v2 = vld [vmem:[#allocation4 + $0xc] ss:$16 sps:$4 sm:$0xff]  }
  0x9e   : > { %5415 = vmatprep.subr.bf16.mxu1 %v6321_v0  ;;  %996 = vmatpush1.bf16.msra.mxu0 %v5561_v17  ;;  %v6637_v1 = vld [vmem:[#allocation4 + $0x8] ss:$16 sps:$4 sm:$0xff]   ;;  %v6641_v3 = vld [vmem:[#allocation4 + $0x2c] ss:$16 sps:$4 sm:$0xff]   ;;  %v6679_v16 = vshrl.u32 %v811_v15, 7  ;;  %s6969_s12 = sld [smem:[#allocation16_spill]] }
  0x9f   : > { %997 = vmatprep.subr.bf16.mxu0 %v5569_v18  ;;  %v6645_v4 = vld [vmem:[#allocation4 + $0x28] ss:$16 sps:$4 sm:$0xff]   ;;  %v6648_v5 = vld [vmem:[#allocation4 + $0x4c] ss:$16 sps:$4 sm:$0xff]   ;;  %v6687_v18 = vld [vmem:[%s6941_s8] sm:$0xf] }
  0xa0   : > { %v6651_v6 = vld [vmem:[#allocation4 + $0x48] ss:$16 sps:$4 sm:$0xff]   ;;  %v6666_v11 = vld [vmem:[#allocation4 + $0xac] ss:$16 sps:$4 sm:$0xff]   ;;  %v6682_v17 = vsub.s32 0, %v6679_v16  ;;  %s4857_s14 = sshll.u32 %s6973_s18, 3 }
  0xa1   : > { %5416 = vmatpush3.bf16.msra.mxu1 %v5545_v7  ;;  %v6654_v7 = vld [vmem:[#allocation4 + $0x6c] ss:$16 sps:$4 sm:$0xff]   ;;  %v6669_v12 = vld [vmem:[#allocation4 + $0xa8] ss:$16 sps:$4 sm:$0xff]   ;;  %s6970_s23 = sld [smem:[#allocation17_spill]] }
  0xa2   : > { %5417 = vmatprep.subr.bf16.mxu1 %v6321_v0  ;;  %998 = vmatpush1.bf16.msra.mxu0 %v5567_v19  ;;  %v6675_v14 = vld [vmem:[#allocation4 + $0xc8] ss:$16 sps:$4 sm:$0xff]   ;;  %v6691_v19 = vrot.slane %v6687_v18, %v6682_v17 }
  0xa3   : > { %999 = vmatprep.subr.bf16.mxu0 %v5575_v20  ;;  %v6694_v20 = vsub.s32 3, %v6679_v16 }
  0xa5   : > { %5418 = vmatpush3.bf16.msra.mxu1 %v5546_v8  ;;  %v6657_v8 = vld [vmem:[#allocation4 + $0x68] ss:$16 sps:$4 sm:$0xff]  }
  0xa6   : > { %5419 = vmatprep.subr.bf16.mxu1 %v6321_v0  ;;  %1000 = vmatpush1.bf16.msra.mxu0 %v5573_v21 }
  0xa7   : > { %1001 = vmatprep.subr.bf16.mxu0 %v5581_v22  ;;  %s589_s26 = scalar_lea.vmem %s6970_s23, %s4857_s14 }
  0xa9   : > { %5420 = vmatpush3.bf16.msra.mxu1 %v5547_v9  ;;  %v6660_v9 = vld [vmem:[#allocation4 + $0x8c] ss:$16 sps:$4 sm:$0xff]  }
  0xaa   : > { %5421 = vmatprep.subr.bf16.mxu1 %v6321_v0  ;;  %1002 = vmatpush1.bf16.msra.mxu0 %v5579_v23 }
  0xab   : > { %1003 = vmatprep.subr.bf16.mxu0 %v5587_v45 }
  0xad   : > { %5422 = vmatpush3.bf16.msra.mxu1 %v5548_v10  ;;  %v6663_v10 = vld [vmem:[#allocation4 + $0x88] ss:$16 sps:$4 sm:$0xff]  }
  0xae   : > { %1032 = vmatprep.subr.bf16.mxu1 %v5554_v13  ;;  %1004 = vmatpush1.bf16.msra.mxu0 %v5585_v47  ;;  %v6672_v13 = vld [vmem:[#allocation4 + $0xcc] ss:$16 sps:$4 sm:$0xff]  }
  0xaf   : > { %1005 = vmatprep.subr.bf16.mxu0 %v5593_v49 }
  0xb2   : > { %1006 = vmatpush1.bf16.msra.mxu0 %v5591_v51 }
  0xb3   : > { %5427 = vmatprep.subr.bf16.mxu0 %v6321_v0 }
 0x168   : > { %v652_v25 = vpop.f32.mrb[0].mxu0 }
 0x169   : > { %v653_v26 = vadd.f32 %v4858_v24, %v652_v25  ;;  %v5405_v27 = vpop.f32.mrb[1].mxu0  ;;  %v6699_v25 = vrot.slane %v6687_v18, %v6694_v20 }
 0x16a   : > { %v655_v28 = vpop.f32.mrb[2].mxu0 }
 0x16b   : > { %v656_v29 = vadd.f32 %v4858_v24, %v655_v28  ;;  %v5406_v30 = vpop.f32.mrb[3].mxu0  ;;  %v659_v31 = vmax.f32 %v653_v26, 0.0 }
 0x16d   : > { %v660_v32 = vmax.f32 %v656_v29, 0.0 }
 0x16f   : > { %v661_v34 = vpack.c.bf16 %v660_v32, %v659_v31 }
 0x171   : > { %5424 = vmatmul.mubr.bf16.vlgmr.msra.gmra.mrb[0].mxu1 %v661_v34 }
 0x172   : > { %1033 = vmatpush1.bf16.msra.mxu1 %v5552_v33  ;;  %1064 = vmatprep.mubr.bf16.mxu1 %v6323_v53  ;;  %v6703_v33 = vsub.s32 2, %v6679_v16 }
 0x173   : > { %1034 = vmatprep.subr.bf16.mxu1 %v5560_v35 }
 0x176   : > { %1035 = vmatpush1.bf16.msra.mxu1 %v5558_v36 }
 0x177   : > { %1036 = vmatprep.subr.bf16.mxu1 %v5566_v37  ;;  %v6709_v37 = vrot.slane %v6687_v18, %v6703_v33 }
 0x17a   : > { %1037 = vmatpush1.bf16.msra.mxu1 %v5564_v38 }
 0x17b   : > { %1038 = vmatprep.subr.bf16.mxu1 %v5572_v39 }
 0x17e   : > { %1039 = vmatpush1.bf16.msra.mxu1 %v5570_v40 }
 0x17f   : > { %1040 = vmatprep.subr.bf16.mxu1 %v5578_v41 }
 0x182   : > { %1041 = vmatpush1.bf16.msra.mxu1 %v5576_v42 }
 0x183   : > { %1042 = vmatprep.subr.bf16.mxu1 %v5584_v43 }
 0x186   : > { %1043 = vmatpush1.bf16.msra.mxu1 %v5582_v44 }
 0x187   : > { %1044 = vmatprep.subr.bf16.mxu1 %v5590_v46 }
 0x18a   : > { %1045 = vmatpush1.bf16.msra.mxu1 %v5588_v48 }
 0x18b   : > { %1046 = vmatprep.subr.bf16.mxu1 %v5596_v50 }
 0x18e   : > { %1047 = vmatpush1.bf16.msra.mxu1 %v5594_v52 }
 0x18f   : > { %1397 = vmatprep.subr.bf16.mxu1 %v6639_v2 }
 0x244   : > { %v767_v55 = vpop.f32.mrb[0].mxu1 }
 0x245   : > { %v768_v56 = vadd.f32 %v4862_v54, %v767_v55  ;;  %v5425_v57 = vpop.f32.mrb[1].mxu1 }
 0x246   : > { %v770_v58 = vpop.f32.mrb[2].mxu1 }
 0x247   : > { %v771_v59 = vadd.f32 %v4862_v54, %v770_v58  ;;  %v5426_v60 = vpop.f32.mrb[3].mxu1  ;;  %v774_v61 = vmax.f32 %v768_v56, 0.0 }
 0x249   : > { %v775_v62 = vmax.f32 %v771_v59, 0.0 }
 0x24b   : > { %v777_v63 = vpack.c.bf16 %v775_v62, %v774_v61 }
 0x24d   : > { %1024 = vmatmul.mubr.bf16.vlgmr.msra.gmra.mrb[4].mxu0 %v777_v63  ;;  %1065 = vmatmul.mubr.bf16.vlgmr.msra.gmra.mrb[4].mxu1 %v777_v63  ;;  %v6719_v63 = vld [vmem:[#allocation4 + $0x4] ss:$16 sps:$4 sm:$0xff]  }
 0x24e   : > { %5429 = vmatprep.mubr.msk.bf16.mxu0 %vm6322_vm0, %v6321_v0  ;;  %1429 = vmatprep.mubr.bf16.mxu1 %v6323_v53 }
 0x24f   : > { %1398 = vmatpush1.bf16.msra.mxu1 %v6637_v1 }
 0x250   : > { %1399 = vmatprep.subr.bf16.mxu1 %v6641_v3 }
 0x253   : > { %1400 = vmatpush1.bf16.msra.mxu1 %v6645_v4 }
 0x254   : > { %1401 = vmatprep.subr.bf16.mxu1 %v6648_v5 }
 0x257   : > { %1402 = vmatpush1.bf16.msra.mxu1 %v6651_v6 }
 0x258   : > { %1403 = vmatprep.subr.bf16.mxu1 %v6654_v7 }
 0x25b   : > { %1404 = vmatpush1.bf16.msra.mxu1 %v6657_v8 }
 0x25c   : > { %1405 = vmatprep.subr.bf16.mxu1 %v6660_v9 }
 0x25f   : > { %1406 = vmatpush1.bf16.msra.mxu1 %v6663_v10 }
 0x260   : > { %1407 = vmatprep.subr.bf16.mxu1 %v6666_v11 }
 0x263   : > { %1408 = vmatpush1.bf16.msra.mxu1 %v6669_v12 }
 0x264   : > { %1409 = vmatprep.subr.bf16.mxu1 %v6672_v13 }
 0x267   : > { %1410 = vmatpush1.bf16.msra.mxu1 %v6675_v14 }
 0x320   : > { %v1025_v21 = vpop.f32.mrb[4].mxu0  ;;  %v1066_v22 = vpop.f32.mrb[4].mxu1 }
 0x321   : > { %v1026_v23 = vadd.f32 %v1025_v21, %v6691_v19  ;;  %v1027_v24 = vpop.f32.mrb[5].mxu0  ;;  %v1068_v26 = vpop.f32.mrb[5].mxu1  ;;  %v1067_v40 = vadd.f32 %v1066_v22, %v6709_v37  ;;  %v6722_v21 = vld [vmem:[%s6635_s29] sm:$0xff]  }
 0x322   : > { %v1028_v27 = vpop.f32.mrb[6].mxu0  ;;  %v1070_v28 = vpop.f32.mrb[6].mxu1  ;;  %v1069_v34 = vadd.f32 %v1068_v26, %v6699_v25  ;;  %v6724_v22 = vld [vmem:[#allocation4] ss:$16 sps:$4 sm:$0xff]   ;;  %v6736_v26 = vld [vmem:[#allocation4 + $0x44] ss:$16 sps:$4 sm:$0xff]  }
 0x323   : > { %v4903_v29 = vmul.f32 -1.442695, %v1026_v23  ;;  %v1029_v30 = vadd.f32 %v1028_v27, %v6691_v19  ;;  %v1030_v31 = vpop.f32.mrb[7].mxu0  ;;  %v1072_v32 = vpop.f32.mrb[7].mxu1  ;;  %v1071_v42 = vadd.f32 %v1070_v28, %v6709_v37  ;;  %v6727_v23 = vld [vmem:[#allocation4 + $0x24] ss:$16 sps:$4 sm:$0xff]  }
 0x324   : > { %v1073_v36 = vadd.f32 %v1072_v32, %v6699_v25  ;;  %v4905_v38 = vmul.f32 -1.442695, %v1069_v34  ;;  %v6732_v24 = vld [vmem:[#allocation4 + $0x20] ss:$16 sps:$4 sm:$0xff]   ;;  %v6742_v28 = vld [vmem:[#allocation4 + $0x64] ss:$16 sps:$4 sm:$0xff]  }
 0x325   : > { %6062 = vpow2.f32 %v4903_v29  ;;  %v4904_v35 = vmul.f32 -1.442695, %v1029_v30  ;;  %v6739_v27 = vld [vmem:[#allocation4 + $0x40] ss:$16 sps:$4 sm:$0xff]   ;;  %v6748_v30 = vld [vmem:[#allocation4 + $0x84] ss:$16 sps:$4 sm:$0xff]  }
 0x326   : > { %v4906_v39 = vmul.f32 -1.442695, %v1073_v36  ;;  %v6745_v29 = vld [vmem:[#allocation4 + $0x60] ss:$16 sps:$4 sm:$0xff]   ;;  %v6754_v32 = vld [vmem:[#allocation4 + $0xa4] ss:$16 sps:$4 sm:$0xff]  }
 0x327   : > { %6064 = vpow2.f32 %v4904_v35  ;;  %v6751_v31 = vld [vmem:[#allocation4 + $0x80] ss:$16 sps:$4 sm:$0xff]   ;;  %v6760_v35 = vld [vmem:[#allocation4 + $0xc4] ss:$16 sps:$4 sm:$0xff]  }
 0x328   : > { %6066 = vpow2.f32 %v4905_v38  ;;  %v6757_v34 = vld [vmem:[#allocation4 + $0xa0] ss:$16 sps:$4 sm:$0xff]   ;;  %v6767_v38 = vld [vmem:[#allocation4 + $0xe4] ss:$16 sps:$4 sm:$0xff]  }
 0x329   : > { %6068 = vpow2.f32 %v4906_v39  ;;  %v6763_v36 = vld [vmem:[#allocation4 + $0xc0] ss:$16 sps:$4 sm:$0xff]   ;;  %v5645_v39 = vld [vmem:[#allocation4 + $0xec] ss:$16 sps:$4 sm:$0xff]  }
 0x32a   : > { %6070 = vtanh.f32 %v1067_v40  ;;  %v6769_v40 = vld [vmem:[#allocation4 + $0xe0] ss:$16 sps:$4 sm:$0xff]   ;;  %1411 = vmatprep.subr.bf16.mxu1 %v5645_v39 }
 0x32f   : > { %v6063_v41 = vpop.eup %6062 }
 0x330   : > { %v1081_v43 = vadd.f32 1.0, %v6063_v41  ;;  %v5643_v41 = vld [vmem:[#allocation4 + $0xe8] ss:$16 sps:$4 sm:$0xff]  }
 0x331   : > { %v6065_v44 = vpop.eup %6064  ;;  %1412 = vmatpush1.bf16.msra.mxu1 %v5643_v41 }
 0x332   : > { %6072 = vrcp.f32 %v1081_v43  ;;  %v1082_v45 = vadd.f32 1.0, %v6065_v44  ;;  %v6067_v46 = vpop.eup %6066  ;;  %1768 = vmatprep.subr.bf16.mxu1 %v6639_v2 }
 0x333   : > { %6074 = vtanh.f32 %v1071_v42  ;;  %v6069_v47 = vpop.eup %6068  ;;  %v1095_v48 = vadd.f32 1.0, %v6067_v46 }
 0x334   : > { %6076 = vrcp.f32 %v1082_v45  ;;  %v6071_v49 = vpop.eup %6070  ;;  %v1096_v51 = vadd.f32 1.0, %v6069_v47 }
 0x335   : > { %6078 = vrcp.f32 %v1095_v48 }
 0x33c   : > { %v6073_v50 = vpop.eup %6072 }
 0x33d   : > { %v6075_v52 = vpop.eup %6074  ;;  %v6713_v54 = vmul.f32 %v6073_v50, %v6071_v49 }
 0x33e   : > { %v6077_v55 = vpop.eup %6076 }
 0x33f   : > { %6080 = vtanh.f32 %v6713_v54  ;;  %v6716_v56 = vmul.f32 %v6077_v55, %v6075_v52  ;;  %v6079_v57 = vpop.eup %6078 }
 0x340   : > { %6082 = vrcp.f32 %v1096_v51 }
 0x341   : > { %6084 = vtanh.f32 %v6716_v56 }
 0x349   : > { %v6081_v58 = vpop.eup %6080 }
 0x34a   : > { %v6083_v59 = vpop.eup %6082  ;;  %v1105_v61 = vmul.f32 %v6081_v58, %v6079_v57 }
 0x34b   : > { %v6085_v60 = vpop.eup %6084 }
 0x34c   : > { %v1106_v62 = vmul.f32 %v6085_v60, %v6083_v59 }
 0x34e   : > { %v1109_v15 = vpack.c.bf16 %v1106_v62, %v1105_v61 }
 0x350   : > { %5428 = vmatpush3.bf16.msra.mxu0 %v1109_v15 }
 0x351   : > { %1354 = vmatprep.subr.bf16.mxu0 %v6719_v63 }
 0x353   : > { %5430 = vmatmul.mubr.msk.bf16.vlgmr.msra.gmra.mrb[8].mxu0 %vm614_vm1, %v6722_v21 }
 0x354   : > { %1355 = vmatpush1.bf16.msra.mxu0 %v6724_v22  ;;  %1386 = vmatprep.mubr.bf16.mxu0 %v6323_v53 }
 0x355   : > { %1356 = vmatprep.subr.bf16.mxu0 %v6727_v23 }
 0x358   : > { %1357 = vmatpush1.bf16.msra.mxu0 %v6732_v24 }
 0x359   : > { %1358 = vmatprep.subr.bf16.mxu0 %v6736_v26 }
 0x35c   : > { %1359 = vmatpush1.bf16.msra.mxu0 %v6739_v27 }
 0x35d   : > { %1360 = vmatprep.subr.bf16.mxu0 %v6742_v28 }
 0x360   : > { %1361 = vmatpush1.bf16.msra.mxu0 %v6745_v29 }
 0x361   : > { %1362 = vmatprep.subr.bf16.mxu0 %v6748_v30 }
 0x364   : > { %1363 = vmatpush1.bf16.msra.mxu0 %v6751_v31 }
 0x365   : > { %1364 = vmatprep.subr.bf16.mxu0 %v6754_v32 }
 0x368   : > { %1365 = vmatpush1.bf16.msra.mxu0 %v6757_v34 }
 0x369   : > { %1366 = vmatprep.subr.bf16.mxu0 %v6760_v35 }
 0x36c   : > { %1367 = vmatpush1.bf16.msra.mxu0 %v6763_v36 }
 0x36d   : > { %1368 = vmatprep.subr.bf16.mxu0 %v6767_v38 }
 0x370   : > { %1369 = vmatpush1.bf16.msra.mxu0 %v6769_v40 }
 0x371   : > { %5433 = vmatprep.subr.bf16.mxu0 %v6321_v0 }
 0x426   : > { %v1152_v42 = vpop.f32.mrb[8].mxu0 }
 0x427   : > { %v5431_v43 = vpop.f32.mrb[9].mxu0  ;;  %v1159_v45 = vadd.f32 %v1152_v42, %v1105_v61 }
 0x428   : > { %v1155_v44 = vpop.f32.mrb[10].mxu0 }
 0x429   : > { %v1160_v46 = vadd.f32 %v1155_v44, %v1106_v62  ;;  %v5432_v47 = vpop.f32.mrb[11].mxu0 }
 0x42b   : > { %v1161_v48 = vpack.c.bf16 %v1160_v46, %v1159_v45 }
 0x42d   : > { %1387 = vmatmul.mubr.bf16.vlgmr.msra.gmra.mrb[12].mxu0 %v1161_v48  ;;  %1430 = vmatmul.mubr.bf16.vlgmr.msra.gmra.mrb[8].mxu1 %v1161_v48 }
 0x42e   : > { %5435 = vmatprep.mubr.msk.bf16.mxu0 %vm6322_vm0, %v6321_v0  ;;  %1769 = vmatpush1.bf16.msra.mxu1 %v6637_v1  ;;  %v6792_v0 = vsub.s32 1, %v6679_v16 }
 0x42f   : > { %1770 = vmatprep.subr.bf16.mxu1 %v6641_v3  ;;  %1800 = vmatprep.mubr.bf16.mxu1 %v6323_v53 }
 0x430   : > { %v6796_v1 = vrot.slane %v6687_v18, %v6792_v0 }
 0x432   : > { %1771 = vmatpush1.bf16.msra.mxu1 %v6645_v4 }
 0x433   : > { %1772 = vmatprep.subr.bf16.mxu1 %v6648_v5 }
 0x436   : > { %1773 = vmatpush1.bf16.msra.mxu1 %v6651_v6 }
 0x437   : > { %1774 = vmatprep.subr.bf16.mxu1 %v6654_v7 }
 0x43a   : > { %1775 = vmatpush1.bf16.msra.mxu1 %v6657_v8 }
 0x43b   : > { %1776 = vmatprep.subr.bf16.mxu1 %v6660_v9 }
 0x43e   : > { %1777 = vmatpush1.bf16.msra.mxu1 %v6663_v10 }
 0x43f   : > { %1778 = vmatprep.subr.bf16.mxu1 %v6666_v11 }
 0x442   : > { %1779 = vmatpush1.bf16.msra.mxu1 %v6669_v12 }
 0x443   : > { %1780 = vmatprep.subr.bf16.mxu1 %v6672_v13 }
 0x446   : > { %1781 = vmatpush1.bf16.msra.mxu1 %v6675_v14 }
 0x447   : > { %1782 = vmatprep.subr.bf16.mxu1 %v5645_v39 }
 0x44a   : > { %1783 = vmatpush1.bf16.msra.mxu1 %v5643_v41 }
 0x500   : > { %v1388_v2 = vpop.f32.mrb[12].mxu0  ;;  %v1431_v3 = vpop.f32.mrb[8].mxu1 }
 0x501   : > { %v1389_v4 = vadd.f32 %v1388_v2, %v6691_v19  ;;  %v1390_v5 = vpop.f32.mrb[13].mxu0  ;;  %v1433_v6 = vpop.f32.mrb[9].mxu1  ;;  %v1432_v52 = vadd.f32 %v1431_v3, %v6709_v37 }
 0x502   : > { %v1391_v7 = vadd.f32 %v1390_v5, %v6796_v1  ;;  %v1392_v8 = vpop.f32.mrb[14].mxu0  ;;  %v1435_v9 = vpop.f32.mrb[10].mxu1  ;;  %v1434_v51 = vadd.f32 %v1433_v6, %v6699_v25 }
 0x503   : > { %v4941_v10 = vmul.f32 -1.442695, %v1389_v4  ;;  %v1393_v11 = vadd.f32 %v1392_v8, %v6691_v19  ;;  %v1394_v12 = vpop.f32.mrb[15].mxu0  ;;  %v1437_v13 = vpop.f32.mrb[11].mxu1  ;;  %v1436_v58 = vadd.f32 %v1435_v9, %v6709_v37 }
 0x504   : > { %v4943_v14 = vmul.f32 -1.442695, %v1391_v7  ;;  %v1395_v49 = vadd.f32 %v1394_v12, %v6796_v1  ;;  %v4945_v55 = vmul.f32 -1.442695, %v1434_v51  ;;  %v1438_v57 = vadd.f32 %v1437_v13, %v6699_v25 }
 0x505   : > { %6086 = vpow2.f32 %v4941_v10  ;;  %v4942_v18 = vmul.f32 -1.442695, %v1393_v11 }
 0x506   : > { %6088 = vpow2.f32 %v4943_v14  ;;  %v4944_v50 = vmul.f32 -1.442695, %v1395_v49  ;;  %v4946_v62 = vmul.f32 -1.442695, %v1438_v57 }
 0x507   : > { %6090 = vpow2.f32 %v4942_v18 }
 0x508   : > { %6092 = vpow2.f32 %v4944_v50 }
 0x509   : > { %6094 = vtanh.f32 %v1432_v52 }
 0x50a   : > { %6096 = vpow2.f32 %v4945_v55  ;;  %v1873_v55 = vld [vmem:[#allocation6 + $0x68] sm:$0xff] }
 0x50b   : > { %6098 = vtanh.f32 %v1436_v58 }
 0x50f   : > { %v6087_v59 = vpop.eup %6086 }
 0x510   : > { %v6089_v60 = vpop.eup %6088  ;;  %v1446_v61 = vadd.f32 1.0, %v6087_v59 }
 0x511   : > { %v1458_v15 = vadd.f32 1.0, %v6089_v60  ;;  %v6091_v39 = vpop.eup %6090  ;;  %v1876_v60 = vld [vmem:[#allocation6 + $0x80] sm:$0xff] }
 0x512   : > { %6100 = vrcp.f32 %v1446_v61  ;;  %v1447_v41 = vadd.f32 1.0, %v6091_v39  ;;  %v6093_v42 = vpop.eup %6092  ;;  %v1880_v61 = vld [vmem:[#allocation6 + $0xa0] sm:$0xff]  ;;  %v1881_v39 = vld [vmem:[#allocation6 + $0xa8] sm:$0xff] }
 0x513   : > { %6102 = vrcp.f32 %v1458_v15  ;;  %v1459_v43 = vadd.f32 1.0, %v6093_v42  ;;  %v6095_v44 = vpop.eup %6094  ;;  %v5003_v15 = vcombine.high %v1876_v60, %v1880_v61 }
 0x514   : > { %6104 = vpow2.f32 %v4946_v62  ;;  %v6097_v45 = vpop.eup %6096  ;;  %v1877_v62 = vld [vmem:[#allocation6 + $0x88] sm:$0xff] }
 0x515   : > { %6106 = vrcp.f32 %v1447_v41  ;;  %v6099_v46 = vpop.eup %6098  ;;  %v1472_v6 = vadd.f32 1.0, %v6097_v45  ;;  %v5002_v41 = vcombine.low %v1876_v60, %v1880_v61  ;;  %v5004_v42 = vcombine.low %v1877_v62, %v1881_v39  ;;  %v1888_v45 = vld [vmem:[#allocation6 + $0xe0] sm:$0xff] }
 0x516   : > { %6108 = vrcp.f32 %v1459_v43  ;;  %v5005_v43 = vcombine.high %v1877_v62, %v1881_v39 }
 0x517   : > { %6110 = vrcp.f32 %v1472_v6  ;;  %v1896_v6 = vld [vmem:[#allocation6 + $0x120] sm:$0xff] }
 0x51c   : > { %v6101_v47 = vpop.eup %6100 }
 0x51d   : > { %v6103_v48 = vpop.eup %6102  ;;  %v1480_v2 = vmul.f32 %v6101_v47, %v6095_v44  ;;  %v1884_v44 = vld [vmem:[#allocation6 + $0xc0] sm:$0xff] }
 0x51e   : > { %v6105_v3 = vpop.eup %6104  ;;  %v1478_v4 = vmul.f32 %v6103_v48, %v6713_v54  ;;  %v5011_v47 = vcombine.high %v1884_v44, %v1888_v45  ;;  %v1889_v48 = vld [vmem:[#allocation6 + $0xe8] sm:$0xff] }
 0x51f   : > { %v6107_v5 = vpop.eup %6106  ;;  %v1473_v10 = vadd.f32 1.0, %v6105_v3 }
 0x520   : > { %v6807_v7 = vadd.f32 %v1480_v2, %v1478_v4  ;;  %v1481_v8 = vmul.f32 %v6107_v5, %v6099_v46  ;;  %v6109_v9 = vpop.eup %6108  ;;  %v1885_v46 = vld [vmem:[#allocation6 + $0xc8] sm:$0xff]  ;;  %v5010_v2 = vcombine.low %v1884_v44, %v1888_v45  ;;  %v1892_v5 = vld [vmem:[#allocation6 + $0x100] sm:$0xff] }
 0x521   : > { %v1479_v11 = vmul.f32 %v6109_v9, %v6716_v56  ;;  %v6111_v13 = vpop.eup %6110  ;;  %v5012_v3 = vcombine.low %v1885_v46, %v1889_v48  ;;  %v5013_v4 = vcombine.high %v1885_v46, %v1889_v48  ;;  %v5019_v9 = vcombine.high %v1892_v5, %v1896_v6 }
 0x522   : > { %6112 = vtanh.f32 %v6807_v7 }
 0x523   : > { %v6811_v12 = vadd.f32 %v1481_v8, %v1479_v11  ;;  %6114 = vrcp.f32 %v1473_v10  ;;  %v1893_v8 = vld [vmem:[#allocation6 + $0x108] sm:$0xff]  ;;  %v5018_v11 = vcombine.low %v1892_v5, %v1896_v6 }
 0x524   : > { %v1897_v10 = vld [vmem:[#allocation6 + $0x128] sm:$0xff] }
 0x525   : > { %6116 = vtanh.f32 %v6811_v12 }
 0x52c   : > { %v6113_v14 = vpop.eup %6112 }
 0x52d   : > { %v6115_v54 = vpop.eup %6114  ;;  %v1486_v18 = vmul.f32 %v6113_v14, %v6111_v13  ;;  %v5020_v13 = vcombine.low %v1893_v8, %v1897_v10  ;;  %v5021_v14 = vcombine.high %v1893_v8, %v1897_v10 }
 0x52f   : > { %v6117_v49 = vpop.eup %6116 }
 0x530   : > { %v1487_v50 = vmul.f32 %v6117_v49, %v6115_v54  ;;  %v1900_v54 = vld [vmem:[#allocation6 + $0x140] sm:$0xff] }
 0x531   : > { %v1904_v49 = vld [vmem:[#allocation6 + $0x160] sm:$0xff] }
 0x532   : > { %v1488_v51 = vpack.c.bf16 %v1487_v50, %v1486_v18 }
 0x534   : > { %5434 = vmatpush3.bf16.msra.mxu0 %v1488_v51  ;;  %v5027_v51 = vcombine.high %v1900_v54, %v1904_v49 }
 0x535   : > { %1725 = vmatprep.subr.bf16.mxu0 %v6719_v63 }
 0x537   : > { %5436 = vmatmul.mubr.msk.bf16.vlgmr.msra.gmra.mrb[16].mxu0 %vm614_vm1, %v6722_v21 }
 0x538   : > { %1726 = vmatpush1.bf16.msra.mxu0 %v6724_v22  ;;  %1757 = vmatprep.mubr.bf16.mxu0 %v6323_v53 }
 0x539   : > { %1727 = vmatprep.subr.bf16.mxu0 %v6727_v23 }
 0x53c   : > { %1728 = vmatpush1.bf16.msra.mxu0 %v6732_v24 }
 0x53d   : > { %1729 = vmatprep.subr.bf16.mxu0 %v6736_v26 }
 0x540   : > { %1730 = vmatpush1.bf16.msra.mxu0 %v6739_v27  ;;  %v1860_v27 = vld [vmem:[#allocation6] sm:$0xff] }
 0x541   : > { %1731 = vmatprep.subr.bf16.mxu0 %v6742_v28  ;;  %v1864_v28 = vld [vmem:[#allocation6 + $0x20] sm:$0xff] }
 0x544   : > { %1732 = vmatpush1.bf16.msra.mxu0 %v6745_v29  ;;  %v1861_v29 = vld [vmem:[#allocation6 + $0x8] sm:$0xff] }
 0x545   : > { %1733 = vmatprep.subr.bf16.mxu0 %v6748_v30  ;;  %v4987_v30 = vcombine.high %v1860_v27, %v1864_v28 }
 0x548   : > { %1734 = vmatpush1.bf16.msra.mxu0 %v6751_v31  ;;  %v1865_v31 = vld [vmem:[#allocation6 + $0x28] sm:$0xff] }
 0x549   : > { %1735 = vmatprep.subr.bf16.mxu0 %v6754_v32  ;;  %v4986_v32 = vcombine.low %v1860_v27, %v1864_v28  ;;  %v1913_v27 = vld [vmem:[#allocation6 + $0x1a8] sm:$0xff]  ;;  %v1916_v28 = vld [vmem:[#allocation6 + $0x1c0] sm:$0xff] }
 0x54c   : > { %1736 = vmatpush1.bf16.msra.mxu0 %v6757_v34  ;;  %v4988_v34 = vcombine.low %v1861_v29, %v1865_v31 }
 0x54d   : > { %1737 = vmatprep.subr.bf16.mxu0 %v6760_v35  ;;  %v4989_v35 = vcombine.high %v1861_v29, %v1865_v31  ;;  %v1917_v31 = vld [vmem:[#allocation6 + $0x1c8] sm:$0xff] }
 0x54f   : > { %2329 = vmatprep.subr.bf16.mxu1 %v4989_v35  ;;  %v6837_v35 = vld [vmem:[#allocation6 + $0x30] sm:$0xff] }
 0x550   : > { %1738 = vmatpush1.bf16.msra.mxu0 %v6763_v36  ;;  %v1868_v36 = vld [vmem:[#allocation6 + $0x40] sm:$0xff] }
 0x551   : > { %1739 = vmatprep.subr.bf16.mxu0 %v6767_v38  ;;  %v1872_v38 = vld [vmem:[#allocation6 + $0x60] sm:$0xff] }
 0x552   : > { %v4995_v52 = vcombine.high %v1868_v36, %v1872_v38  ;;  %v4994_v57 = vcombine.low %v1868_v36, %v1872_v38  ;;  %v6839_v36 = vld [vmem:[#allocation6 + $0x18] sm:$0xff] }
 0x554   : > { %1740 = vmatpush1.bf16.msra.mxu0 %v6769_v40  ;;  %v1869_v40 = vld [vmem:[#allocation6 + $0x48] sm:$0xff] }
 0x555   : > { %2286 = vmatprep.subr.bf16.mxu0 %v4987_v30  ;;  %v4996_v58 = vcombine.low %v1869_v40, %v1873_v55  ;;  %v4997_v59 = vcombine.high %v1869_v40, %v1873_v55  ;;  %v1920_v30 = vld [vmem:[#allocation6 + $0x1e0] sm:$0xff] }
 0x556   : > { %v5042_v60 = vcombine.low %v1916_v28, %v1920_v30 }
 0x60a   : > { %v1523_v56 = vpop.f32.mrb[16].mxu0 }
 0x60b   : > { %v5437_v63 = vpop.f32.mrb[17].mxu0  ;;  %v1530_v22 = vadd.f32 %v1523_v56, %v1486_v18  ;;  %v1901_v18 = vld [vmem:[#allocation6 + $0x148] sm:$0xff] }
 0x60c   : > { %v1526_v21 = vpop.f32.mrb[18].mxu0  ;;  %v1905_v56 = vld [vmem:[#allocation6 + $0x168] sm:$0xff]  ;;  %v1908_v63 = vld [vmem:[#allocation6 + $0x180] sm:$0xff] }
 0x60d   : > { %v1531_v23 = vadd.f32 %v1526_v21, %v1487_v50  ;;  %v5438_v24 = vpop.f32.mrb[19].mxu0  ;;  %v5026_v50 = vcombine.low %v1900_v54, %v1904_v49  ;;  %v1912_v21 = vld [vmem:[#allocation6 + $0x1a0] sm:$0xff] }
 0x60e   : > { %v5035_v24 = vcombine.high %v1908_v63, %v1912_v21  ;;  %v5034_v38 = vcombine.low %v1908_v63, %v1912_v21 }
 0x60f   : > { %v1532_v26 = vpack.c.bf16 %v1531_v23, %v1530_v22  ;;  %v5028_v22 = vcombine.low %v1901_v18, %v1905_v56  ;;  %v5029_v23 = vcombine.high %v1901_v18, %v1905_v56 }
 0x611   : > { %1758 = vmatmul.mubr.bf16.vlgmr.msra.gmra.mrb[20].mxu0 %v1532_v26  ;;  %1801 = vmatmul.mubr.bf16.vlgmr.msra.gmra.mrb[12].mxu1 %v1532_v26  ;;  %v1909_v26 = vld [vmem:[#allocation6 + $0x188] sm:$0xff] }
 0x612   : > { %2318 = vmatprep.mubr.bf16.mxu0 %v6323_v53  ;;  %2361 = vmatprep.mubr.bf16.mxu1 %v6323_v53  ;;  %v5037_v29 = vcombine.high %v1909_v26, %v1913_v27  ;;  %v5036_v55 = vcombine.low %v1909_v26, %v1913_v27 }
 0x613   : > { %2287 = vmatpush1.bf16.msra.mxu0 %v4986_v32  ;;  %2330 = vmatpush1.bf16.msra.mxu1 %v4988_v34  ;;  %v1921_v32 = vld [vmem:[#allocation6 + $0x1e8] sm:$0xff]  ;;  %v6835_v34 = vld [vmem:[#allocation6 + $0x10] sm:$0xff] }
 0x614   : > { %2288 = vmatprep.subr.bf16.mxu0 %v4995_v52  ;;  %2331 = vmatprep.subr.bf16.mxu1 %v4997_v59  ;;  %v4990_v40 = vcombine.low %v6835_v34, %v6837_v35  ;;  %v6843_v52 = vld [vmem:[#allocation6 + $0x38] sm:$0xff]  ;;  %v5045_v59 = vcombine.high %v1917_v31, %v1921_v32  ;;  %v5044_v61 = vcombine.low %v1917_v31, %v1921_v32 }
 0x615   : > { %v4991_v62 = vcombine.high %v6835_v34, %v6837_v35 }
 0x617   : > { %2289 = vmatpush1.bf16.msra.mxu0 %v4994_v57  ;;  %2332 = vmatpush1.bf16.msra.mxu1 %v4996_v58  ;;  %v5043_v57 = vcombine.high %v1916_v28, %v1920_v30  ;;  %v4992_v58 = vcombine.low %v6839_v36, %v6843_v52 }
 0x618   : > { %2290 = vmatprep.subr.bf16.mxu0 %v5003_v15  ;;  %2333 = vmatprep.subr.bf16.mxu1 %v5005_v43  ;;  %v4993_v15 = vcombine.high %v6839_v36, %v6843_v52  ;;  %v1894_v52 = vld [vmem:[#allocation6 + $0x110] sm:$0xff] }
 0x61b   : > { %2291 = vmatpush1.bf16.msra.mxu0 %v5002_v41  ;;  %2334 = vmatpush1.bf16.msra.mxu1 %v5004_v42 }
 0x61c   : > { %2292 = vmatprep.subr.bf16.mxu0 %v5011_v47  ;;  %2335 = vmatprep.subr.bf16.mxu1 %v5013_v4 }
 0x61f   : > { %2293 = vmatpush1.bf16.msra.mxu0 %v5010_v2  ;;  %2336 = vmatpush1.bf16.msra.mxu1 %v5012_v3 }
 0x620   : > { %2294 = vmatprep.subr.bf16.mxu0 %v5019_v9  ;;  %2337 = vmatprep.subr.bf16.mxu1 %v5021_v14 }
 0x623   : > { %2295 = vmatpush1.bf16.msra.mxu0 %v5018_v11  ;;  %2338 = vmatpush1.bf16.msra.mxu1 %v5020_v13 }
 0x624   : > { %2296 = vmatprep.subr.bf16.mxu0 %v5027_v51  ;;  %2339 = vmatprep.subr.bf16.mxu1 %v5029_v23 }
 0x627   : > { %2297 = vmatpush1.bf16.msra.mxu0 %v5026_v50  ;;  %2340 = vmatpush1.bf16.msra.mxu1 %v5028_v22 }
 0x628   : > { %2298 = vmatprep.subr.bf16.mxu0 %v5035_v24  ;;  %2341 = vmatprep.subr.bf16.mxu1 %v5037_v29 }
 0x62b   : > { %2299 = vmatpush1.bf16.msra.mxu0 %v5034_v38  ;;  %2342 = vmatpush1.bf16.msra.mxu1 %v5036_v55 }
 0x62c   : > { %2300 = vmatprep.subr.bf16.mxu0 %v5043_v57  ;;  %2343 = vmatprep.subr.bf16.mxu1 %v5045_v59 }
 0x62f   : > { %2301 = vmatpush1.bf16.msra.mxu0 %v5042_v60  ;;  %2344 = vmatpush1.bf16.msra.mxu1 %v5044_v61 }
 0x630   : > { %2372 = vmatprep.subr.bf16.mxu0 %v4991_v62  ;;  %2415 = vmatprep.subr.bf16.mxu1 %v4993_v15 }
 0x6e4   : > { %v1759_v39 = vpop.f32.mrb[20].mxu0  ;;  %v1802_v41 = vpop.f32.mrb[12].mxu1 }
 0x6e5   : > { %v1760_v42 = vadd.f32 %v1759_v39, %v6691_v19  ;;  %v1761_v43 = vpop.f32.mrb[21].mxu0  ;;  %v1804_v44 = vpop.f32.mrb[13].mxu1  ;;  %v1803_v11 = vadd.f32 %v1802_v41, %v6709_v37  ;;  %v1870_v39 = vld [vmem:[#allocation6 + $0x50] sm:$0xff] }
 0x6e6   : > { %v1762_v45 = vadd.f32 %v1761_v43, %v6796_v1  ;;  %v1763_v46 = vpop.f32.mrb[22].mxu0  ;;  %v1806_v47 = vpop.f32.mrb[14].mxu1  ;;  %v1805_v10 = vadd.f32 %v1804_v44, %v6699_v25  ;;  %v1875_v43 = vld [vmem:[#allocation6 + $0x78] sm:$0xff] }
 0x6e7   : > { %v4980_v48 = vmul.f32 -1.442695, %v1760_v42  ;;  %v1764_v2 = vadd.f32 %v1763_v46, %v6691_v19  ;;  %v1765_v3 = vpop.f32.mrb[23].mxu0  ;;  %v1808_v4 = vpop.f32.mrb[15].mxu1  ;;  %v1807_v19 = vadd.f32 %v1806_v47, %v6709_v37  ;;  %v1874_v42 = vld [vmem:[#allocation6 + $0x70] sm:$0xff] }
 0x6e8   : > { %v4982_v5 = vmul.f32 -1.442695, %v1762_v45  ;;  %v1766_v6 = vadd.f32 %v1765_v3, %v6796_v1  ;;  %v4984_v13 = vmul.f32 -1.442695, %v1805_v10  ;;  %v1809_v14 = vadd.f32 %v1808_v4, %v6699_v25  ;;  %v1883_v3 = vld [vmem:[#allocation6 + $0xb8] sm:$0xff]  ;;  %v1890_v10 = vld [vmem:[#allocation6 + $0xf0] sm:$0xff] }
 0x6e9   : > { %6118 = vpow2.f32 %v4980_v48  ;;  %v4981_v8 = vmul.f32 -1.442695, %v1764_v2  ;;  %v4999_v46 = vcombine.high %v1870_v39, %v1874_v42  ;;  %v1878_v48 = vld [vmem:[#allocation6 + $0x90] sm:$0xff]  ;;  %v4998_v4 = vcombine.low %v1870_v39, %v1874_v42 }
 0x6ea   : > { %6120 = vpow2.f32 %v4982_v5  ;;  %v4983_v9 = vmul.f32 -1.442695, %v1766_v6  ;;  %v4985_v1 = vmul.f32 -1.442695, %v1809_v14  ;;  %v1882_v2 = vld [vmem:[#allocation6 + $0xb0] sm:$0xff]  ;;  %v1895_v14 = vld [vmem:[#allocation6 + $0x118] sm:$0xff] }
 0x6eb   : > { %6122 = vpow2.f32 %v4981_v8  ;;  %v5007_v6 = vcombine.high %v1878_v48, %v1882_v2  ;;  %v5006_v34 = vcombine.low %v1878_v48, %v1882_v2  ;;  %v5648_v39 = vld [vmem:[#allocation7 + $0x4] ss:$16 sps:$4 sm:$0xff]   ;;  %v5646_v42 = vld [vmem:[#allocation7] ss:$16 sps:$4 sm:$0xff]   ;;  %v5663_v2 = vld [vmem:[#allocation7 + $0x4c] ss:$16 sps:$4 sm:$0xff]  }
 0x6ec   : > { %6124 = vpow2.f32 %v4983_v9  ;;  %v1886_v9 = vld [vmem:[#allocation6 + $0xd0] sm:$0xff] }
 0x6ed   : > { %6126 = vtanh.f32 %v1803_v11  ;;  %v1887_v11 = vld [vmem:[#allocation6 + $0xd8] sm:$0xff]  ;;  %v5015_v36 = vcombine.high %v1886_v9, %v1890_v10  ;;  %v5660_v48 = vld [vmem:[#allocation7 + $0x44] ss:$16 sps:$4 sm:$0xff]  }
 0x6ee   : > { %6128 = vpow2.f32 %v4984_v13  ;;  %v1891_v13 = vld [vmem:[#allocation6 + $0xf8] sm:$0xff] }
 0x6ef   : > { %6130 = vtanh.f32 %v1807_v19  ;;  %v1899_v19 = vld [vmem:[#allocation6 + $0x138] sm:$0xff] }
 0x6f3   : > { %v6119_v54 = vpop.eup %6118 }
 0x6f4   : > { %v6121_v49 = vpop.eup %6120  ;;  %v1817_v18 = vadd.f32 1.0, %v6119_v54  ;;  %v5014_v54 = vcombine.low %v1886_v9, %v1890_v10  ;;  %v5675_v9 = vld [vmem:[#allocation7 + $0x8c] ss:$16 sps:$4 sm:$0xff]   ;;  %v5670_v10 = vld [vmem:[#allocation7 + $0x80] ss:$16 sps:$4 sm:$0xff]  }
 0x6f5   : > { %v1829_v50 = vadd.f32 1.0, %v6121_v49  ;;  %v6123_v51 = vpop.eup %6122  ;;  %v5016_v49 = vcombine.low %v1887_v11, %v1891_v13 }
 0x6f6   : > { %6132 = vrcp.f32 %v1817_v18  ;;  %v1818_v56 = vadd.f32 1.0, %v6123_v51  ;;  %v6125_v63 = vpop.eup %6124  ;;  %v1903_v51 = vld [vmem:[#allocation6 + $0x158] sm:$0xff] }
 0x6f7   : > { %6134 = vrcp.f32 %v1829_v50  ;;  %v1830_v21 = vadd.f32 1.0, %v6125_v63  ;;  %v6127_v25 = vpop.eup %6126  ;;  %v1906_v50 = vld [vmem:[#allocation6 + $0x170] sm:$0xff] }
 0x6f8   : > { %6136 = vpow2.f32 %v4985_v1  ;;  %v6129_v22 = vpop.eup %6128  ;;  %v1902_v1 = vld [vmem:[#allocation6 + $0x150] sm:$0xff] }
 0x6f9   : > { %6138 = vrcp.f32 %v1818_v56  ;;  %v6131_v37 = vpop.eup %6130  ;;  %v1843_v27 = vadd.f32 1.0, %v6129_v22  ;;  %v1907_v56 = vld [vmem:[#allocation6 + $0x178] sm:$0xff] }
 0x6fa   : > { %6140 = vrcp.f32 %v1830_v21  ;;  %v5024_v21 = vcombine.low %v1895_v14, %v1899_v19  ;;  %v5033_v22 = vcombine.high %v1903_v51, %v1907_v56 }
 0x6fb   : > { %6142 = vrcp.f32 %v1843_v27  ;;  %v5030_v27 = vcombine.low %v1902_v1, %v1906_v50 }
 0x700   : > { %v6133_v23 = vpop.eup %6132 }
 0x701   : > { %v6135_v24 = vpop.eup %6134  ;;  %v1851_v26 = vmul.f32 %v6133_v23, %v6127_v25  ;;  %v5031_v25 = vcombine.high %v1902_v1, %v1906_v50  ;;  %v1914_v23 = vld [vmem:[#allocation6 + $0x1b0] sm:$0xff]  ;;  %v5699_v1 = vld [vmem:[#allocation7 + $0x10c] ss:$16 sps:$4 sm:$0xff]  }
 0x702   : > { %v6137_v28 = vpop.eup %6136  ;;  %v1849_v29 = vmul.f32 %v6135_v24, %v6807_v7  ;;  %v1871_v7 = vld [vmem:[#allocation6 + $0x58] sm:$0xff]  ;;  %v5694_v50 = vld [vmem:[#allocation7 + $0x100] ss:$16 sps:$4 sm:$0xff]  }
 0x703   : > { %v6139_v30 = vpop.eup %6138  ;;  %v1844_v55 = vadd.f32 1.0, %v6137_v28  ;;  %v5001_v47 = vcombine.high %v1871_v7, %v1875_v43  ;;  %v5000_v5 = vcombine.low %v1871_v7, %v1875_v43  ;;  %v1911_v24 = vld [vmem:[#allocation6 + $0x198] sm:$0xff]  ;;  %v5032_v28 = vcombine.low %v1903_v51, %v1907_v56  ;;  %v5654_v43 = vld [vmem:[#allocation7 + $0x24] ss:$16 sps:$4 sm:$0xff]  }
 0x704   : > { %v1853_v31 = vadd.f32 %v1851_v26, %v1849_v29  ;;  %v1852_v32 = vmul.f32 %v6139_v30, %v6131_v37  ;;  %v6141_v38 = vpop.eup %6140  ;;  %v1910_v37 = vld [vmem:[#allocation6 + $0x190] sm:$0xff]  ;;  %v1915_v26 = vld [vmem:[#allocation6 + $0x1b8] sm:$0xff] }
 0x705   : > { %v1850_v57 = vmul.f32 %v6141_v38, %v6811_v12  ;;  %v6143_v60 = vpop.eup %6142  ;;  %v1879_v12 = vld [vmem:[#allocation6 + $0x98] sm:$0xff]  ;;  %v5039_v29 = vcombine.high %v1910_v37, %v1914_v23  ;;  %v5041_v30 = vcombine.high %v1911_v24, %v1915_v26  ;;  %v5702_v56 = vld [vmem:[#allocation7 + $0x124] ss:$16 sps:$4 sm:$0xff]  }
 0x706   : > { %6144 = vtanh.f32 %v1853_v31  ;;  %v5009_v8 = vcombine.high %v1879_v12, %v1883_v3  ;;  %v5008_v35 = vcombine.low %v1879_v12, %v1883_v3  ;;  %v1918_v31 = vld [vmem:[#allocation6 + $0x1d0] sm:$0xff]  ;;  %v1919_v38 = vld [vmem:[#allocation6 + $0x1d8] sm:$0xff] }
 0x707   : > { %v1854_v59 = vadd.f32 %v1852_v32, %v1850_v57  ;;  %6146 = vrcp.f32 %v1844_v55  ;;  %v1922_v32 = vld [vmem:[#allocation6 + $0x1f0] sm:$0xff]  ;;  %v1923_v55 = vld [vmem:[#allocation6 + $0x1f8] sm:$0xff]  ;;  %v5038_v57 = vcombine.low %v1910_v37, %v1914_v23 }
 0x708   : > { %v5649_v7 = vld [vmem:[#allocation7 + $0x8] ss:$16 sps:$4 sm:$0xff]   ;;  %v5658_v12 = vld [vmem:[#allocation7 + $0x40] ss:$16 sps:$4 sm:$0xff]   ;;  %v5711_v37 = vld [vmem:[#allocation7 + $0x14c] ss:$16 sps:$4 sm:$0xff]  }
 0x709   : > { %6148 = vtanh.f32 %v1854_v59  ;;  %v5040_v59 = vcombine.low %v1911_v24, %v1915_v26  ;;  %v5661_v3 = vld [vmem:[#allocation7 + $0x48] ss:$16 sps:$4 sm:$0xff]   ;;  %v5706_v23 = vld [vmem:[#allocation7 + $0x140] ss:$16 sps:$4 sm:$0xff]   ;;  %v5714_v26 = vld [vmem:[#allocation7 + $0x164] ss:$16 sps:$4 sm:$0xff]  }
 0x70a   : > { %v5697_v51 = vld [vmem:[#allocation7 + $0x108] ss:$16 sps:$4 sm:$0xff]  }
 0x70b   : > { %v5709_v24 = vld [vmem:[#allocation7 + $0x148] ss:$16 sps:$4 sm:$0xff]  }
 0x710   : > { %v6145_v61 = vpop.eup %6144 }
 0x711   : > { %v1857_v62 = vmul.f32 %v6145_v61, %v6143_v60  ;;  %v6147_v15 = vpop.eup %6146  ;;  %v5047_v60 = vcombine.high %v1918_v31, %v1922_v32  ;;  %v5049_v61 = vcombine.high %v1919_v38, %v1923_v55 }
 0x713   : > { %v6149_v41 = vpop.eup %6148 }
 0x714   : > { %v1858_v44 = vmul.f32 %v6149_v41, %v6147_v15  ;;  %v5048_v15 = vcombine.low %v1919_v38, %v1923_v55  ;;  %v5651_v41 = vld [vmem:[#allocation7 + $0xc] ss:$16 sps:$4 sm:$0xff]   ;;  %v5721_v38 = vld [vmem:[#allocation7 + $0x188] ss:$16 sps:$4 sm:$0xff]   ;;  %v5726_v55 = vld [vmem:[#allocation7 + $0x1a4] ss:$16 sps:$4 sm:$0xff]  }
 0x716   : > { %v6861_v45 = vpack.c.bf16 %v1858_v44, %v1857_v62  ;;  %v5046_v62 = vcombine.low %v1918_v31, %v1922_v32  ;;  %v5657_v44 = vld [vmem:[#allocation7 + $0x2c] ss:$16 sps:$4 sm:$0xff]   ;;  %v5718_v32 = vld [vmem:[#allocation7 + $0x180] ss:$16 sps:$4 sm:$0xff]  }
 0x717   : > { %v5723_v31 = vld [vmem:[#allocation7 + $0x18c] ss:$16 sps:$4 sm:$0xff]  }
 0x718   : > { %2319 = vmatmul.mubr.bf16.vlgmr.msra.gmra.mrb[24].mxu0 %v6861_v45  ;;  %2362 = vmatmul.mubr.bf16.vlgmr.msra.gmra.mrb[16].mxu1 %v6861_v45 }
 0x719   : > { %2373 = vmatpush1.bf16.msra.mxu0 %v4990_v40  ;;  %2416 = vmatpush1.bf16.msra.mxu1 %v4992_v58  ;;  %v5017_v40 = vcombine.high %v1887_v11, %v1891_v13  ;;  %v1898_v58 = vld [vmem:[#allocation6 + $0x130] sm:$0xff]  ;;  %v5673_v11 = vld [vmem:[#allocation7 + $0x88] ss:$16 sps:$4 sm:$0xff]  }
 0x71a   : > { %2374 = vmatprep.subr.bf16.mxu0 %v4999_v46  ;;  %2417 = vmatprep.subr.bf16.mxu1 %v5001_v47  ;;  %v5023_v18 = vcombine.high %v1894_v52, %v1898_v58  ;;  %v5022_v63 = vcombine.low %v1894_v52, %v1898_v58  ;;  %v5652_v46 = vld [vmem:[#allocation7 + $0x20] ss:$16 sps:$4 sm:$0xff]   ;;  %v5655_v47 = vld [vmem:[#allocation7 + $0x28] ss:$16 sps:$4 sm:$0xff]   ;;  %v5678_v13 = vld [vmem:[#allocation7 + $0xa4] ss:$16 sps:$4 sm:$0xff]  }
 0x71b   : > { %2404 = vmatprep.mubr.bf16.mxu0 %v6323_v53  ;;  %2447 = vmatprep.mubr.bf16.mxu1 %v6323_v53  ;;  %v5025_v53 = vcombine.high %v1895_v14, %v1899_v19  ;;  %v5687_v52 = vld [vmem:[#allocation7 + $0xcc] ss:$16 sps:$4 sm:$0xff]   ;;  %v5682_v58 = vld [vmem:[#allocation7 + $0xc0] ss:$16 sps:$4 sm:$0xff]   ;;  %v5685_v14 = vld [vmem:[#allocation7 + $0xc8] ss:$16 sps:$4 sm:$0xff]  }
 0x71c   : > { %v5690_v19 = vld [vmem:[#allocation7 + $0xe4] ss:$16 sps:$4 sm:$0xff]  }
 0x71d   : > { %2375 = vmatpush1.bf16.msra.mxu0 %v4998_v4  ;;  %2418 = vmatpush1.bf16.msra.mxu1 %v5000_v5  ;;  %v5666_v4 = vld [vmem:[#allocation7 + $0x64] ss:$16 sps:$4 sm:$0xff]   ;;  %v5669_v5 = vld [vmem:[#allocation7 + $0x6c] ss:$16 sps:$4 sm:$0xff]  }
 0x71e   : > { %2376 = vmatprep.subr.bf16.mxu0 %v5007_v6  ;;  %2419 = vmatprep.subr.bf16.mxu1 %v5009_v8  ;;  %v5664_v6 = vld [vmem:[#allocation7 + $0x60] ss:$16 sps:$4 sm:$0xff]   ;;  %v5672_v8 = vld [vmem:[#allocation7 + $0x84] ss:$16 sps:$4 sm:$0xff]  }
 0x721   : > { %2377 = vmatpush1.bf16.msra.mxu0 %v5006_v34  ;;  %2420 = vmatpush1.bf16.msra.mxu1 %v5008_v35  ;;  %v5681_v34 = vld [vmem:[#allocation7 + $0xac] ss:$16 sps:$4 sm:$0xff]   ;;  %v5676_v35 = vld [vmem:[#allocation7 + $0xa0] ss:$16 sps:$4 sm:$0xff]  }
 0x722   : > { %2378 = vmatprep.subr.bf16.mxu0 %v5015_v36  ;;  %2421 = vmatprep.subr.bf16.mxu1 %v5017_v40  ;;  %v5679_v36 = vld [vmem:[#allocation7 + $0xa8] ss:$16 sps:$4 sm:$0xff]   ;;  %v5684_v40 = vld [vmem:[#allocation7 + $0xc4] ss:$16 sps:$4 sm:$0xff]  }
 0x725   : > { %2379 = vmatpush1.bf16.msra.mxu0 %v5014_v54  ;;  %2422 = vmatpush1.bf16.msra.mxu1 %v5016_v49  ;;  %v5693_v54 = vld [vmem:[#allocation7 + $0xec] ss:$16 sps:$4 sm:$0xff]   ;;  %v5688_v49 = vld [vmem:[#allocation7 + $0xe0] ss:$16 sps:$4 sm:$0xff]  }
 0x726   : > { %2380 = vmatprep.subr.bf16.mxu0 %v5023_v18  ;;  %2423 = vmatprep.subr.bf16.mxu1 %v5025_v53  ;;  %v5691_v18 = vld [vmem:[#allocation7 + $0xe8] ss:$16 sps:$4 sm:$0xff]   ;;  %v5696_v53 = vld [vmem:[#allocation7 + $0x104] ss:$16 sps:$4 sm:$0xff]  }
 0x729   : > { %2381 = vmatpush1.bf16.msra.mxu0 %v5022_v63  ;;  %2424 = vmatpush1.bf16.msra.mxu1 %v5024_v21  ;;  %v5705_v63 = vld [vmem:[#allocation7 + $0x12c] ss:$16 sps:$4 sm:$0xff]   ;;  %v5700_v21 = vld [vmem:[#allocation7 + $0x120] ss:$16 sps:$4 sm:$0xff]  }
 0x72a   : > { %2382 = vmatprep.subr.bf16.mxu0 %v5031_v25  ;;  %2425 = vmatprep.subr.bf16.mxu1 %v5033_v22  ;;  %v5703_v25 = vld [vmem:[#allocation7 + $0x128] ss:$16 sps:$4 sm:$0xff]   ;;  %v5708_v22 = vld [vmem:[#allocation7 + $0x144] ss:$16 sps:$4 sm:$0xff]  }
 0x72d   : > { %2383 = vmatpush1.bf16.msra.mxu0 %v5030_v27  ;;  %2426 = vmatpush1.bf16.msra.mxu1 %v5032_v28  ;;  %v5717_v27 = vld [vmem:[#allocation7 + $0x16c] ss:$16 sps:$4 sm:$0xff]   ;;  %v5712_v28 = vld [vmem:[#allocation7 + $0x160] ss:$16 sps:$4 sm:$0xff]  }
 0x72e   : > { %2384 = vmatprep.subr.bf16.mxu0 %v5039_v29  ;;  %2427 = vmatprep.subr.bf16.mxu1 %v5041_v30  ;;  %v5715_v29 = vld [vmem:[#allocation7 + $0x168] ss:$16 sps:$4 sm:$0xff]   ;;  %v5720_v30 = vld [vmem:[#allocation7 + $0x184] ss:$16 sps:$4 sm:$0xff]  }
 0x731   : > { %2385 = vmatpush1.bf16.msra.mxu0 %v5038_v57  ;;  %2428 = vmatpush1.bf16.msra.mxu1 %v5040_v59  ;;  %v5729_v57 = vld [vmem:[#allocation7 + $0x1ac] ss:$16 sps:$4 sm:$0xff]   ;;  %v5724_v59 = vld [vmem:[#allocation7 + $0x1a0] ss:$16 sps:$4 sm:$0xff]  }
 0x732   : > { %2386 = vmatprep.subr.bf16.mxu0 %v5047_v60  ;;  %2429 = vmatprep.subr.bf16.mxu1 %v5049_v61  ;;  %v5727_v60 = vld [vmem:[#allocation7 + $0x1a8] ss:$16 sps:$4 sm:$0xff]   ;;  %v5732_v61 = vld [vmem:[#allocation7 + $0x1c4] ss:$16 sps:$4 sm:$0xff]  }
 0x735   : > { %2387 = vmatpush1.bf16.msra.mxu0 %v5046_v62  ;;  %2430 = vmatpush1.bf16.msra.mxu1 %v5048_v15  ;;  %v5735_v62 = vld [vmem:[#allocation7 + $0x1cc] ss:$16 sps:$4 sm:$0xff]   ;;  %v5730_v15 = vld [vmem:[#allocation7 + $0x1c0] ss:$16 sps:$4 sm:$0xff]  }
 0x736   : > { %4024 = vmatprep.subr.bf16.mxu0 %v5648_v39  ;;  %4196 = vmatprep.subr.bf16.mxu1 %v5651_v41  ;;  %v5733_v39 = vld [vmem:[#allocation7 + $0x1c8] ss:$16 sps:$4 sm:$0xff]   ;;  %v5738_v41 = vld [vmem:[#allocation7 + $0x1e4] ss:$16 sps:$4 sm:$0xff]  }
 0x738   : > { %2405 = vmatmul.mubr.bf16.vlgmr.msra.gmra.mrb[28].mxu0 %v6861_v45  ;;  %2448 = vmatmul.mubr.bf16.vlgmr.msra.gmra.mrb[20].mxu1 %v6861_v45  ;;  %v5667_v45 = vld [vmem:[#allocation7 + $0x68] ss:$16 sps:$4 sm:$0xff]  }
 0x739   : > { %4025 = vmatpush1.bf16.msra.mxu0 %v5646_v42  ;;  %4197 = vmatpush1.bf16.msra.mxu1 %v5649_v7  ;;  %v5741_v42 = vld [vmem:[#allocation7 + $0x1ec] ss:$16 sps:$4 sm:$0xff]   ;;  %v5736_v7 = vld [vmem:[#allocation7 + $0x1e0] ss:$16 sps:$4 sm:$0xff]  }
 0x73a   : > { %4026 = vmatprep.subr.bf16.mxu0 %v5654_v43  ;;  %4198 = vmatprep.subr.bf16.mxu1 %v5657_v44  ;;  %v5739_v43 = vld [vmem:[#allocation7 + $0x1e8] ss:$16 sps:$4 sm:$0xff]   ;;  %v5744_v44 = vld [vmem:[#allocation7 + $0x204] ss:$16 sps:$4 sm:$0xff]  }
 0x73d   : > { %4027 = vmatpush1.bf16.msra.mxu0 %v5652_v46  ;;  %4199 = vmatpush1.bf16.msra.mxu1 %v5655_v47  ;;  %v5747_v46 = vld [vmem:[#allocation7 + $0x20c] ss:$16 sps:$4 sm:$0xff]   ;;  %v6878_v47 = vld [vmem:[%s6967_s17] sm:$0xff] }
 0x73e   : > { %4028 = vmatprep.subr.bf16.mxu0 %v5660_v48  ;;  %4200 = vmatprep.subr.bf16.mxu1 %v5663_v2  ;;  %v1929_v48 = vrot.slane %v6878_v47, %v6682_v17  ;;  %v1937_v2 = vrot.slane %v6878_v47, %v6703_v33 }
 0x741   : > { %4029 = vmatpush1.bf16.msra.mxu0 %v5658_v12  ;;  %4201 = vmatpush1.bf16.msra.mxu1 %v5661_v3 }
 0x742   : > { %4030 = vmatprep.subr.bf16.mxu0 %v5666_v4  ;;  %4202 = vmatprep.subr.bf16.mxu1 %v5669_v5  ;;  %v1933_v4 = vrot.slane %v6878_v47, %v6792_v0  ;;  %v1941_v5 = vrot.slane %v6878_v47, %v6694_v20 }
 0x745   : > { %4031 = vmatpush1.bf16.msra.mxu0 %v5664_v6  ;;  %4203 = vmatpush1.bf16.msra.mxu1 %v5667_v45 }
 0x746   : > { %4032 = vmatprep.subr.bf16.mxu0 %v5672_v8  ;;  %4204 = vmatprep.subr.bf16.mxu1 %v5675_v9 }
 0x749   : > { %4033 = vmatpush1.bf16.msra.mxu0 %v5670_v10  ;;  %4205 = vmatpush1.bf16.msra.mxu1 %v5673_v11 }
 0x74a   : > { %4034 = vmatprep.subr.bf16.mxu0 %v5678_v13  ;;  %4206 = vmatprep.subr.bf16.mxu1 %v5681_v34 }
 0x74d   : > { %4035 = vmatpush1.bf16.msra.mxu0 %v5676_v35  ;;  %4207 = vmatpush1.bf16.msra.mxu1 %v5679_v36 }
 0x74e   : > { %4036 = vmatprep.subr.bf16.mxu0 %v5684_v40  ;;  %4208 = vmatprep.subr.bf16.mxu1 %v5687_v52 }
 0x751   : > { %4037 = vmatpush1.bf16.msra.mxu0 %v5682_v58  ;;  %4209 = vmatpush1.bf16.msra.mxu1 %v5685_v14 }
 0x752   : > { %4038 = vmatprep.subr.bf16.mxu0 %v5690_v19  ;;  %4210 = vmatprep.subr.bf16.mxu1 %v5693_v54 }
 0x755   : > { %4039 = vmatpush1.bf16.msra.mxu0 %v5688_v49  ;;  %4211 = vmatpush1.bf16.msra.mxu1 %v5691_v18 }
 0x756   : > { %4040 = vmatprep.subr.bf16.mxu0 %v5696_v53  ;;  %4212 = vmatprep.subr.bf16.mxu1 %v5699_v1  ;;  %v5742_v53 = vld [vmem:[#allocation7 + $0x200] ss:$16 sps:$4 sm:$0xff]   ;;  %v5745_v1 = vld [vmem:[#allocation7 + $0x208] ss:$16 sps:$4 sm:$0xff]  }
 0x759   : > { %4041 = vmatpush1.bf16.msra.mxu0 %v5694_v50  ;;  %4213 = vmatpush1.bf16.msra.mxu1 %v5697_v51  ;;  %v5750_v50 = vld [vmem:[#allocation7 + $0x224] ss:$16 sps:$4 sm:$0xff]   ;;  %v5753_v51 = vld [vmem:[#allocation7 + $0x22c] ss:$16 sps:$4 sm:$0xff]  }
 0x75a   : > { %4042 = vmatprep.subr.bf16.mxu0 %v5702_v56  ;;  %4214 = vmatprep.subr.bf16.mxu1 %v5705_v63  ;;  %v5748_v56 = vld [vmem:[#allocation7 + $0x220] ss:$16 sps:$4 sm:$0xff]   ;;  %v5751_v63 = vld [vmem:[#allocation7 + $0x228] ss:$16 sps:$4 sm:$0xff]  }
 0x75d   : > { %4043 = vmatpush1.bf16.msra.mxu0 %v5700_v21  ;;  %4215 = vmatpush1.bf16.msra.mxu1 %v5703_v25  ;;  %v5756_v21 = vld [vmem:[#allocation7 + $0x244] ss:$16 sps:$4 sm:$0xff]   ;;  %v5759_v25 = vld [vmem:[#allocation7 + $0x24c] ss:$16 sps:$4 sm:$0xff]  }
 0x75e   : > { %4044 = vmatprep.subr.bf16.mxu0 %v5708_v22  ;;  %4216 = vmatprep.subr.bf16.mxu1 %v5711_v37  ;;  %v5754_v22 = vld [vmem:[#allocation7 + $0x240] ss:$16 sps:$4 sm:$0xff]   ;;  %v5757_v37 = vld [vmem:[#allocation7 + $0x248] ss:$16 sps:$4 sm:$0xff]  }
 0x761   : > { %4045 = vmatpush1.bf16.msra.mxu0 %v5706_v23  ;;  %4217 = vmatpush1.bf16.msra.mxu1 %v5709_v24  ;;  %v5762_v23 = vld [vmem:[#allocation7 + $0x264] ss:$16 sps:$4 sm:$0xff]   ;;  %v5765_v24 = vld [vmem:[#allocation7 + $0x26c] ss:$16 sps:$4 sm:$0xff]  }
 0x762   : > { %4046 = vmatprep.subr.bf16.mxu0 %v5714_v26  ;;  %4218 = vmatprep.subr.bf16.mxu1 %v5717_v27  ;;  %v5760_v26 = vld [vmem:[#allocation7 + $0x260] ss:$16 sps:$4 sm:$0xff]   ;;  %v5763_v27 = vld [vmem:[#allocation7 + $0x268] ss:$16 sps:$4 sm:$0xff]  }
 0x765   : > { %4047 = vmatpush1.bf16.msra.mxu0 %v5712_v28  ;;  %4219 = vmatpush1.bf16.msra.mxu1 %v5715_v29  ;;  %v5768_v28 = vld [vmem:[#allocation7 + $0x284] ss:$16 sps:$4 sm:$0xff]   ;;  %v5771_v29 = vld [vmem:[#allocation7 + $0x28c] ss:$16 sps:$4 sm:$0xff]  }
 0x766   : > { %4048 = vmatprep.subr.bf16.mxu0 %v5720_v30  ;;  %4220 = vmatprep.subr.bf16.mxu1 %v5723_v31  ;;  %v5766_v30 = vld [vmem:[#allocation7 + $0x280] ss:$16 sps:$4 sm:$0xff]   ;;  %v5769_v31 = vld [vmem:[#allocation7 + $0x288] ss:$16 sps:$4 sm:$0xff]  }
 0x769   : > { %4049 = vmatpush1.bf16.msra.mxu0 %v5718_v32  ;;  %4221 = vmatpush1.bf16.msra.mxu1 %v5721_v38  ;;  %v5774_v32 = vld [vmem:[#allocation7 + $0x2a4] ss:$16 sps:$4 sm:$0xff]   ;;  %v5777_v38 = vld [vmem:[#allocation7 + $0x2ac] ss:$16 sps:$4 sm:$0xff]  }
 0x76a   : > { %4050 = vmatprep.subr.bf16.mxu0 %v5726_v55  ;;  %4222 = vmatprep.subr.bf16.mxu1 %v5729_v57  ;;  %v5772_v55 = vld [vmem:[#allocation7 + $0x2a0] ss:$16 sps:$4 sm:$0xff]   ;;  %v5775_v57 = vld [vmem:[#allocation7 + $0x2a8] ss:$16 sps:$4 sm:$0xff]  }
 0x76d   : > { %4051 = vmatpush1.bf16.msra.mxu0 %v5724_v59  ;;  %4223 = vmatpush1.bf16.msra.mxu1 %v5727_v60  ;;  %v1944_v59 = vsub.s32 4, %v6679_v16  ;;  %v1952_v60 = vsub.s32 6, %v6679_v16 }
 0x76e   : > { %4052 = vmatprep.subr.bf16.mxu0 %v5732_v61  ;;  %4224 = vmatprep.subr.bf16.mxu1 %v5735_v62  ;;  %v5780_v61 = vld [vmem:[#allocation7 + $0x2c4] ss:$16 sps:$4 sm:$0xff]   ;;  %v5783_v62 = vld [vmem:[#allocation7 + $0x2cc] ss:$16 sps:$4 sm:$0xff]  }
 0x771   : > { %4053 = vmatpush1.bf16.msra.mxu0 %v5730_v15  ;;  %4225 = vmatpush1.bf16.msra.mxu1 %v5733_v39  ;;  %v1948_v15 = vsub.s32 5, %v6679_v16  ;;  %v1956_v39 = vsub.s32 7, %v6679_v16 }
 0x772   : > { %4054 = vmatprep.subr.bf16.mxu0 %v5738_v41  ;;  %4226 = vmatprep.subr.bf16.mxu1 %v5741_v42  ;;  %v1945_v41 = vrot.slane %v6878_v47, %v1944_v59  ;;  %v5778_v42 = vld [vmem:[#allocation7 + $0x2c0] ss:$16 sps:$4 sm:$0xff]   ;;  %v5823_v59 = vld [vmem:[#allocation7 + $0x3a8] ss:$16 sps:$4 sm:$0xff]  }
 0x775   : > { %4055 = vmatpush1.bf16.msra.mxu0 %v5736_v7  ;;  %4227 = vmatpush1.bf16.msra.mxu1 %v5739_v43  ;;  %v5781_v7 = vld [vmem:[#allocation7 + $0x2c8] ss:$16 sps:$4 sm:$0xff]   ;;  %v1953_v43 = vrot.slane %v6878_v47, %v1952_v60  ;;  %v5828_v60 = vld [vmem:[#allocation7 + $0x3c4] ss:$16 sps:$4 sm:$0xff]  }
 0x776   : > { %4067 = vmatprep.subr.bf16.mxu0 %v5744_v44  ;;  %4239 = vmatprep.subr.bf16.mxu1 %v5747_v46  ;;  %v5786_v44 = vld [vmem:[#allocation7 + $0x2e4] ss:$16 sps:$4 sm:$0xff]   ;;  %v5789_v46 = vld [vmem:[#allocation7 + $0x2ec] ss:$16 sps:$4 sm:$0xff]  }
 0x7eb   : > { %v2320_v12 = vpop.f32.mrb[24].mxu0  ;;  %v2363_v3 = vpop.f32.mrb[16].mxu1 }
 0x7ec   : > { %v2322_v6 = vpop.f32.mrb[25].mxu0  ;;  %v2365_v45 = vpop.f32.mrb[17].mxu1  ;;  %v2321_v10 = vadd.f32 %v2320_v12, %v1929_v48  ;;  %v2364_v11 = vadd.f32 %v2363_v3, %v1937_v2  ;;  %v1949_v12 = vrot.slane %v6878_v47, %v1948_v15  ;;  %v1957_v3 = vrot.slane %v6878_v47, %v1956_v39  ;;  %v5829_v15 = vld [vmem:[#allocation7 + $0x3c8] ss:$16 sps:$4 sm:$0xff]   ;;  %v5834_v39 = vld [vmem:[#allocation7 + $0x3e4] ss:$16 sps:$4 sm:$0xff]  }
 0x7ed   : > { %v2324_v8 = vpop.f32.mrb[26].mxu0  ;;  %v2367_v9 = vpop.f32.mrb[18].mxu1  ;;  %v2323_v40 = vadd.f32 %v2322_v6, %v1933_v4  ;;  %v2366_v52 = vadd.f32 %v2365_v45, %v1941_v5 }
 0x7ee   : > { %v2325_v13 = vadd.f32 %v2324_v8, %v1929_v48  ;;  %v2368_v34 = vadd.f32 %v2367_v9, %v1937_v2  ;;  %v2326_v35 = vpop.f32.mrb[27].mxu0  ;;  %v2369_v36 = vpop.f32.mrb[19].mxu1  ;;  %v5784_v8 = vld [vmem:[#allocation7 + $0x2e0] ss:$16 sps:$4 sm:$0xff]   ;;  %v5787_v9 = vld [vmem:[#allocation7 + $0x2e8] ss:$16 sps:$4 sm:$0xff]  }
 0x7ef   : > { %v2327_v58 = vadd.f32 %v2326_v35, %v1933_v4  ;;  %v2370_v14 = vadd.f32 %v2369_v36, %v1941_v5  ;;  %v5792_v36 = vld [vmem:[#allocation7 + $0x304] ss:$16 sps:$4 sm:$0xff]  }
 0x7f0   : > { %v2458_v19 = vpack.c.bf16 %v2325_v13, %v2321_v10  ;;  %v6888_v54 = vpack.c.bf16 %v2368_v34, %v2364_v11 }
 0x7f1   : > { %v2459_v49 = vpack.c.bf16 %v2327_v58, %v2323_v40  ;;  %v2461_v18 = vpack.c.bf16 %v2370_v14, %v2366_v52  ;;  %v5795_v40 = vld [vmem:[#allocation7 + $0x30c] ss:$16 sps:$4 sm:$0xff]  }
 0x7f3   : > { %4056 = vmatprep.mubr.bf16.mxu0 %v2459_v49  ;;  %4228 = vmatprep.mubr.bf16.mxu1 %v2459_v49 }
 0x7f4   : > { %4057 = vmatmul.mubr.bf16.vlgmr.msra.gmra.mrb[32].mxu0 %v2458_v19  ;;  %4229 = vmatmul.mubr.bf16.vlgmr.msra.gmra.mrb[24].mxu1 %v2458_v19 }
 0x7f5   : > { %4068 = vmatpush1.bf16.msra.mxu0 %v5742_v53  ;;  %4240 = vmatpush1.bf16.msra.mxu1 %v5745_v1  ;;  %v5790_v1 = vld [vmem:[#allocation7 + $0x300] ss:$16 sps:$4 sm:$0xff]  }
 0x7f6   : > { %4099 = vmatprep.mubr.bf16.mxu0 %v2461_v18  ;;  %4271 = vmatprep.mubr.bf16.mxu1 %v2461_v18 }
 0x7f7   : > { %4069 = vmatprep.subr.bf16.mxu0 %v5750_v50  ;;  %4241 = vmatprep.subr.bf16.mxu1 %v5753_v51  ;;  %v5793_v50 = vld [vmem:[#allocation7 + $0x308] ss:$16 sps:$4 sm:$0xff]   ;;  %v5798_v51 = vld [vmem:[#allocation7 + $0x324] ss:$16 sps:$4 sm:$0xff]  }
 0x7f9   : > { %4070 = vmatpush1.bf16.msra.mxu0 %v5748_v56  ;;  %4242 = vmatpush1.bf16.msra.mxu1 %v5751_v63  ;;  %v5801_v56 = vld [vmem:[#allocation7 + $0x32c] ss:$16 sps:$4 sm:$0xff]   ;;  %v5796_v63 = vld [vmem:[#allocation7 + $0x320] ss:$16 sps:$4 sm:$0xff]  }
 0x7fa   : > { %4071 = vmatprep.subr.bf16.mxu0 %v5756_v21  ;;  %4243 = vmatprep.subr.bf16.mxu1 %v5759_v25  ;;  %v5799_v21 = vld [vmem:[#allocation7 + $0x328] ss:$16 sps:$4 sm:$0xff]   ;;  %v5804_v25 = vld [vmem:[#allocation7 + $0x344] ss:$16 sps:$4 sm:$0xff]  }
 0x7fd   : > { %4072 = vmatpush1.bf16.msra.mxu0 %v5754_v22  ;;  %4244 = vmatpush1.bf16.msra.mxu1 %v5757_v37  ;;  %v5807_v22 = vld [vmem:[#allocation7 + $0x34c] ss:$16 sps:$4 sm:$0xff]   ;;  %v5802_v37 = vld [vmem:[#allocation7 + $0x340] ss:$16 sps:$4 sm:$0xff]  }
 0x7fe   : > { %4073 = vmatprep.subr.bf16.mxu0 %v5762_v23  ;;  %4245 = vmatprep.subr.bf16.mxu1 %v5765_v24  ;;  %v5805_v23 = vld [vmem:[#allocation7 + $0x348] ss:$16 sps:$4 sm:$0xff]   ;;  %v5810_v24 = vld [vmem:[#allocation7 + $0x364] ss:$16 sps:$4 sm:$0xff]  }
 0x801   : > { %4074 = vmatpush1.bf16.msra.mxu0 %v5760_v26  ;;  %4246 = vmatpush1.bf16.msra.mxu1 %v5763_v27  ;;  %v5813_v26 = vld [vmem:[#allocation7 + $0x36c] ss:$16 sps:$4 sm:$0xff]   ;;  %v5808_v27 = vld [vmem:[#allocation7 + $0x360] ss:$16 sps:$4 sm:$0xff]  }
 0x802   : > { %4075 = vmatprep.subr.bf16.mxu0 %v5768_v28  ;;  %4247 = vmatprep.subr.bf16.mxu1 %v5771_v29  ;;  %v5811_v28 = vld [vmem:[#allocation7 + $0x368] ss:$16 sps:$4 sm:$0xff]   ;;  %v5816_v29 = vld [vmem:[#allocation7 + $0x384] ss:$16 sps:$4 sm:$0xff]  }
 0x805   : > { %4076 = vmatpush1.bf16.msra.mxu0 %v5766_v30  ;;  %4248 = vmatpush1.bf16.msra.mxu1 %v5769_v31  ;;  %v5819_v30 = vld [vmem:[#allocation7 + $0x38c] ss:$16 sps:$4 sm:$0xff]   ;;  %v5814_v31 = vld [vmem:[#allocation7 + $0x380] ss:$16 sps:$4 sm:$0xff]  }
 0x806   : > { %4077 = vmatprep.subr.bf16.mxu0 %v5774_v32  ;;  %4249 = vmatprep.subr.bf16.mxu1 %v5777_v38  ;;  %v5817_v32 = vld [vmem:[#allocation7 + $0x388] ss:$16 sps:$4 sm:$0xff]   ;;  %v5822_v38 = vld [vmem:[#allocation7 + $0x3a4] ss:$16 sps:$4 sm:$0xff]  }
 0x809   : > { %4078 = vmatpush1.bf16.msra.mxu0 %v5772_v55  ;;  %4250 = vmatpush1.bf16.msra.mxu1 %v5775_v57  ;;  %v5825_v55 = vld [vmem:[#allocation7 + $0x3ac] ss:$16 sps:$4 sm:$0xff]   ;;  %v5820_v57 = vld [vmem:[#allocation7 + $0x3a0] ss:$16 sps:$4 sm:$0xff]  }
 0x80a   : > { %4079 = vmatprep.subr.bf16.mxu0 %v5780_v61  ;;  %4251 = vmatprep.subr.bf16.mxu1 %v5783_v62  ;;  %v5831_v61 = vld [vmem:[#allocation7 + $0x3cc] ss:$16 sps:$4 sm:$0xff]   ;;  %v5826_v62 = vld [vmem:[#allocation7 + $0x3c0] ss:$16 sps:$4 sm:$0xff]  }
 0x80b   : > { %v2406_v48 = vpop.f32.mrb[28].mxu0  ;;  %v2449_v2 = vpop.f32.mrb[20].mxu1 }
 0x80c   : > { %v2408_v4 = vpop.f32.mrb[29].mxu0  ;;  %v2451_v16 = vpop.f32.mrb[21].mxu1  ;;  %v2407_v5 = vadd.f32 %v2406_v48, %v1945_v41  ;;  %v2450_v10 = vadd.f32 %v2449_v2, %v1953_v43  ;;  %v5841_v48 = vld [vmem:[#allocation7 + $0x408] ss:$16 sps:$4 sm:$0xff]   ;;  %v5846_v2 = vld [vmem:[#allocation7 + $0x424] ss:$16 sps:$4 sm:$0xff]  }
 0x80d   : > { %v2410_v6 = vpop.f32.mrb[30].mxu0  ;;  %v2453_v45 = vpop.f32.mrb[22].mxu1  ;;  %4080 = vmatpush1.bf16.msra.mxu0 %v5778_v42  ;;  %4252 = vmatpush1.bf16.msra.mxu1 %v5781_v7  ;;  %v2409_v52 = vadd.f32 %v2408_v4, %v1949_v12  ;;  %v2452_v47 = vadd.f32 %v2451_v16, %v1957_v3  ;;  %v5832_v42 = vld [vmem:[#allocation7 + $0x3e0] ss:$16 sps:$4 sm:$0xff]   ;;  %v5835_v7 = vld [vmem:[#allocation7 + $0x3e8] ss:$16 sps:$4 sm:$0xff]  }
 0x80e   : > { %v2411_v11 = vadd.f32 %v2410_v6, %v1945_v41  ;;  %v2454_v13 = vadd.f32 %v2453_v45, %v1953_v43  ;;  %v2412_v34 = vpop.f32.mrb[31].mxu0  ;;  %v2455_v35 = vpop.f32.mrb[23].mxu1  ;;  %4081 = vmatprep.subr.bf16.mxu0 %v5786_v44  ;;  %4253 = vmatprep.subr.bf16.mxu1 %v5789_v46  ;;  %v5837_v41 = vld [vmem:[#allocation7 + $0x3ec] ss:$16 sps:$4 sm:$0xff]   ;;  %v5840_v43 = vld [vmem:[#allocation7 + $0x404] ss:$16 sps:$4 sm:$0xff]  }
 0x80f   : > { %v2413_v58 = vadd.f32 %v2412_v34, %v1949_v12  ;;  %v2456_v14 = vadd.f32 %v2455_v35, %v1957_v3  ;;  %v5843_v44 = vld [vmem:[#allocation7 + $0x40c] ss:$16 sps:$4 sm:$0xff]   ;;  %v5838_v46 = vld [vmem:[#allocation7 + $0x400] ss:$16 sps:$4 sm:$0xff]   ;;  %v5847_v4 = vld [vmem:[#allocation7 + $0x428] ss:$16 sps:$4 sm:$0xff]  }
 0x810   : > { %v6898_v19 = vpack.c.bf16 %v2411_v11, %v2407_v5  ;;  %v6900_v49 = vpack.c.bf16 %v2454_v13, %v2450_v10  ;;  %v5849_v12 = vld [vmem:[#allocation7 + $0x42c] ss:$16 sps:$4 sm:$0xff]   ;;  %v5844_v3 = vld [vmem:[#allocation7 + $0x420] ss:$16 sps:$4 sm:$0xff]   ;;  %v5852_v16 = vld [vmem:[#allocation7 + $0x444] ss:$16 sps:$4 sm:$0xff]  }
 0x811   : > { %v6902_v18 = vpack.c.bf16 %v2413_v58, %v2409_v52  ;;  %v6904_v53 = vpack.c.bf16 %v2456_v14, %v2452_v47  ;;  %4082 = vmatpush1.bf16.msra.mxu0 %v5784_v8  ;;  %4254 = vmatpush1.bf16.msra.mxu1 %v5787_v9  ;;  %v5855_v5 = vld [vmem:[#allocation7 + $0x44c] ss:$16 sps:$4 sm:$0xff]   ;;  %v5850_v6 = vld [vmem:[#allocation7 + $0x440] ss:$16 sps:$4 sm:$0xff]   ;;  %v5853_v45 = vld [vmem:[#allocation7 + $0x448] ss:$16 sps:$4 sm:$0xff]  }
 0x812   : > { %4083 = vmatprep.subr.bf16.mxu0 %v5792_v36  ;;  %4255 = vmatprep.subr.bf16.mxu1 %v5795_v40  ;;  %v5858_v8 = vld [vmem:[#allocation7 + $0x464] ss:$16 sps:$4 sm:$0xff]   ;;  %v5856_v9 = vld [vmem:[#allocation7 + $0x460] ss:$16 sps:$4 sm:$0xff]   ;;  %v5859_v10 = vld [vmem:[#allocation7 + $0x468] ss:$16 sps:$4 sm:$0xff]  }
 0x813   : > { %v5864_v11 = vld [vmem:[#allocation7 + $0x484] ss:$16 sps:$4 sm:$0xff]   ;;  %v5867_v13 = vld [vmem:[#allocation7 + $0x48c] ss:$16 sps:$4 sm:$0xff]   ;;  %v5862_v34 = vld [vmem:[#allocation7 + $0x480] ss:$16 sps:$4 sm:$0xff]  }
 0x814   : > { %v5865_v35 = vld [vmem:[#allocation7 + $0x488] ss:$16 sps:$4 sm:$0xff]   ;;  %v5870_v36 = vld [vmem:[#allocation7 + $0x4a4] ss:$16 sps:$4 sm:$0xff]   ;;  %v5873_v40 = vld [vmem:[#allocation7 + $0x4ac] ss:$16 sps:$4 sm:$0xff]  }
 0x815   : > { %4084 = vmatpush1.bf16.msra.mxu0 %v5790_v1  ;;  %4256 = vmatpush1.bf16.msra.mxu1 %v5793_v50  ;;  %v5868_v52 = vld [vmem:[#allocation7 + $0x4a0] ss:$16 sps:$4 sm:$0xff]   ;;  %v5871_v47 = vld [vmem:[#allocation7 + $0x4a8] ss:$16 sps:$4 sm:$0xff]   ;;  %v5876_v58 = vld [vmem:[#allocation7 + $0x4c4] ss:$16 sps:$4 sm:$0xff]  }
 0x816   : > { %4085 = vmatprep.subr.bf16.mxu0 %v5798_v51  ;;  %4257 = vmatprep.subr.bf16.mxu1 %v5801_v56  ;;  %v5879_v14 = vld [vmem:[#allocation7 + $0x4cc] ss:$16 sps:$4 sm:$0xff]   ;;  %v5877_v1 = vld [vmem:[#allocation7 + $0x4c8] ss:$16 sps:$4 sm:$0xff]   ;;  %v5882_v50 = vld [vmem:[#allocation7 + $0x4e4] ss:$16 sps:$4 sm:$0xff]  }
 0x817   : > { %v5885_v51 = vld [vmem:[#allocation7 + $0x4ec] ss:$16 sps:$4 sm:$0xff]   ;;  %v5880_v56 = vld [vmem:[#allocation7 + $0x4e0] ss:$16 sps:$4 sm:$0xff]  }
 0x819   : > { %4086 = vmatpush1.bf16.msra.mxu0 %v5796_v63  ;;  %4258 = vmatpush1.bf16.msra.mxu1 %v5799_v21  ;;  %v5883_v63 = vld [vmem:[#allocation7 + $0x4e8] ss:$16 sps:$4 sm:$0xff]   ;;  %v5888_v21 = vld [vmem:[#allocation7 + $0x504] ss:$16 sps:$4 sm:$0xff]  }
 0x81a   : > { %4087 = vmatprep.subr.bf16.mxu0 %v5804_v25  ;;  %4259 = vmatprep.subr.bf16.mxu1 %v5807_v22  ;;  %v5891_v25 = vld [vmem:[#allocation7 + $0x50c] ss:$16 sps:$4 sm:$0xff]   ;;  %v5886_v22 = vld [vmem:[#allocation7 + $0x500] ss:$16 sps:$4 sm:$0xff]  }
 0x81d   : > { %4088 = vmatpush1.bf16.msra.mxu0 %v5802_v37  ;;  %4260 = vmatpush1.bf16.msra.mxu1 %v5805_v23  ;;  %v5889_v37 = vld [vmem:[#allocation7 + $0x508] ss:$16 sps:$4 sm:$0xff]   ;;  %v5894_v23 = vld [vmem:[#allocation7 + $0x524] ss:$16 sps:$4 sm:$0xff]  }
 0x81e   : > { %4089 = vmatprep.subr.bf16.mxu0 %v5810_v24  ;;  %4261 = vmatprep.subr.bf16.mxu1 %v5813_v26  ;;  %v5897_v24 = vld [vmem:[#allocation7 + $0x52c] ss:$16 sps:$4 sm:$0xff]   ;;  %v5892_v26 = vld [vmem:[#allocation7 + $0x520] ss:$16 sps:$4 sm:$0xff]  }
 0x821   : > { %4090 = vmatpush1.bf16.msra.mxu0 %v5808_v27  ;;  %4262 = vmatpush1.bf16.msra.mxu1 %v5811_v28  ;;  %v5895_v27 = vld [vmem:[#allocation7 + $0x528] ss:$16 sps:$4 sm:$0xff]   ;;  %v5900_v28 = vld [vmem:[#allocation7 + $0x544] ss:$16 sps:$4 sm:$0xff]  }
 0x822   : > { %4091 = vmatprep.subr.bf16.mxu0 %v5816_v29  ;;  %4263 = vmatprep.subr.bf16.mxu1 %v5819_v30  ;;  %v5903_v29 = vld [vmem:[#allocation7 + $0x54c] ss:$16 sps:$4 sm:$0xff]   ;;  %v5898_v30 = vld [vmem:[#allocation7 + $0x540] ss:$16 sps:$4 sm:$0xff]  }
 0x825   : > { %4092 = vmatpush1.bf16.msra.mxu0 %v5814_v31  ;;  %4264 = vmatpush1.bf16.msra.mxu1 %v5817_v32  ;;  %v5901_v31 = vld [vmem:[#allocation7 + $0x548] ss:$16 sps:$4 sm:$0xff]   ;;  %v5906_v32 = vld [vmem:[#allocation7 + $0x564] ss:$16 sps:$4 sm:$0xff]  }
 0x826   : > { %4093 = vmatprep.subr.bf16.mxu0 %v5822_v38  ;;  %4265 = vmatprep.subr.bf16.mxu1 %v5825_v55  ;;  %v5909_v38 = vld [vmem:[#allocation7 + $0x56c] ss:$16 sps:$4 sm:$0xff]   ;;  %v5904_v55 = vld [vmem:[#allocation7 + $0x560] ss:$16 sps:$4 sm:$0xff]  }
 0x829   : > { %4094 = vmatpush1.bf16.msra.mxu0 %v5820_v57  ;;  %4266 = vmatpush1.bf16.msra.mxu1 %v5823_v59  ;;  %v5907_v57 = vld [vmem:[#allocation7 + $0x568] ss:$16 sps:$4 sm:$0xff]   ;;  %v5912_v59 = vld [vmem:[#allocation7 + $0x584] ss:$16 sps:$4 sm:$0xff]  }
 0x82a   : > { %4095 = vmatprep.subr.bf16.mxu0 %v5828_v60  ;;  %4267 = vmatprep.subr.bf16.mxu1 %v5831_v61  ;;  %v5915_v60 = vld [vmem:[#allocation7 + $0x58c] ss:$16 sps:$4 sm:$0xff]   ;;  %v5910_v61 = vld [vmem:[#allocation7 + $0x580] ss:$16 sps:$4 sm:$0xff]  }
 0x82d   : > { %4096 = vmatpush1.bf16.msra.mxu0 %v5826_v62  ;;  %4268 = vmatpush1.bf16.msra.mxu1 %v5829_v15  ;;  %v5913_v62 = vld [vmem:[#allocation7 + $0x588] ss:$16 sps:$4 sm:$0xff]   ;;  %v5918_v15 = vld [vmem:[#allocation7 + $0x5a4] ss:$16 sps:$4 sm:$0xff]  }
 0x82e   : > { %4097 = vmatprep.subr.bf16.mxu0 %v5834_v39  ;;  %4269 = vmatprep.subr.bf16.mxu1 %v5837_v41  ;;  %v5921_v39 = vld [vmem:[#allocation7 + $0x5ac] ss:$16 sps:$4 sm:$0xff]   ;;  %v5916_v41 = vld [vmem:[#allocation7 + $0x5a0] ss:$16 sps:$4 sm:$0xff]  }
 0x831   : > { %4098 = vmatpush1.bf16.msra.mxu0 %v5832_v42  ;;  %4270 = vmatpush1.bf16.msra.mxu1 %v5835_v7  ;;  %v5919_v42 = vld [vmem:[#allocation7 + $0x5a8] ss:$16 sps:$4 sm:$0xff]   ;;  %v5924_v7 = vld [vmem:[#allocation7 + $0x5c4] ss:$16 sps:$4 sm:$0xff]  }
 0x832   : > { %4110 = vmatprep.subr.bf16.mxu0 %v5840_v43  ;;  %4282 = vmatprep.subr.bf16.mxu1 %v5843_v44  ;;  %v5927_v43 = vld [vmem:[#allocation7 + $0x5cc] ss:$16 sps:$4 sm:$0xff]   ;;  %v5922_v44 = vld [vmem:[#allocation7 + $0x5c0] ss:$16 sps:$4 sm:$0xff]  }
 0x834   : > { %4100 = vmatmul.mubr.bf16.vlgmr.msra.gmra.mrb[32].mxu0 %v6888_v54  ;;  %4272 = vmatmul.mubr.bf16.vlgmr.msra.gmra.mrb[24].mxu1 %v6888_v54  ;;  %v5861_v54 = vld [vmem:[#allocation7 + $0x46c] ss:$16 sps:$4 sm:$0xff]  }
 0x835   : > { %4111 = vmatpush1.bf16.msra.mxu0 %v5838_v46  ;;  %4142 = vmatprep.mubr.bf16.mxu0 %v6902_v18  ;;  %v5925_v46 = vld [vmem:[#allocation7 + $0x5c8] ss:$16 sps:$4 sm:$0xff]  }
 0x836   : > { %4283 = vmatpush1.bf16.msra.mxu1 %v5841_v48  ;;  %4314 = vmatprep.mubr.bf16.mxu1 %v6902_v18  ;;  %v5874_v18 = vld [vmem:[#allocation7 + $0x4c0] ss:$16 sps:$4 sm:$0xff]   ;;  %v5930_v48 = vld [vmem:[#allocation7 + $0x5e4] ss:$16 sps:$4 sm:$0xff]  }
 0x837   : > { %4112 = vmatprep.subr.bf16.mxu0 %v5846_v2  ;;  %4284 = vmatprep.subr.bf16.mxu1 %v5849_v12  ;;  %v5933_v2 = vld [vmem:[#allocation7 + $0x5ec] ss:$16 sps:$4 sm:$0xff]   ;;  %v5928_v12 = vld [vmem:[#allocation7 + $0x5e0] ss:$16 sps:$4 sm:$0xff]  }
 0x839   : > { %4113 = vmatpush1.bf16.msra.mxu0 %v5844_v3  ;;  %v5931_v3 = vld [vmem:[#allocation7 + $0x5e8] ss:$16 sps:$4 sm:$0xff]  }
 0x83a   : > { %4285 = vmatpush1.bf16.msra.mxu1 %v5847_v4  ;;  %4114 = vmatprep.subr.bf16.mxu0 %v5852_v16  ;;  %v5936_v4 = vld [vmem:[#allocation7 + $0x604] ss:$16 sps:$4 sm:$0xff]   ;;  %v5939_v16 = vld [vmem:[#allocation7 + $0x60c] ss:$16 sps:$4 sm:$0xff]  }
 0x83b   : > { %4286 = vmatprep.subr.bf16.mxu1 %v5855_v5  ;;  %v5934_v5 = vld [vmem:[#allocation7 + $0x600] ss:$16 sps:$4 sm:$0xff]  }
 0x83d   : > { %4115 = vmatpush1.bf16.msra.mxu0 %v5850_v6  ;;  %v5937_v6 = vld [vmem:[#allocation7 + $0x608] ss:$16 sps:$4 sm:$0xff]  }
 0x83e   : > { %4287 = vmatpush1.bf16.msra.mxu1 %v5853_v45  ;;  %4116 = vmatprep.subr.bf16.mxu0 %v5858_v8  ;;  %v5942_v45 = vld [vmem:[#allocation7 + $0x624] ss:$16 sps:$4 sm:$0xff]   ;;  %v5945_v8 = vld [vmem:[#allocation7 + $0x62c] ss:$16 sps:$4 sm:$0xff]  }
 0x83f   : > { %4288 = vmatprep.subr.bf16.mxu1 %v5861_v54  ;;  %v5940_v54 = vld [vmem:[#allocation7 + $0x620] ss:$16 sps:$4 sm:$0xff]  }
 0x841   : > { %4117 = vmatpush1.bf16.msra.mxu0 %v5856_v9  ;;  %v5943_v9 = vld [vmem:[#allocation7 + $0x628] ss:$16 sps:$4 sm:$0xff]  }
 0x842   : > { %4289 = vmatpush1.bf16.msra.mxu1 %v5859_v10  ;;  %4118 = vmatprep.subr.bf16.mxu0 %v5864_v11  ;;  %v5948_v10 = vld [vmem:[#allocation7 + $0x644] ss:$16 sps:$4 sm:$0xff]   ;;  %v5951_v11 = vld [vmem:[#allocation7 + $0x64c] ss:$16 sps:$4 sm:$0xff]  }
 0x843   : > { %4290 = vmatprep.subr.bf16.mxu1 %v5867_v13  ;;  %v5946_v13 = vld [vmem:[#allocation7 + $0x640] ss:$16 sps:$4 sm:$0xff]  }
 0x845   : > { %4119 = vmatpush1.bf16.msra.mxu0 %v5862_v34  ;;  %v5949_v34 = vld [vmem:[#allocation7 + $0x648] ss:$16 sps:$4 sm:$0xff]  }
 0x846   : > { %4291 = vmatpush1.bf16.msra.mxu1 %v5865_v35  ;;  %4120 = vmatprep.subr.bf16.mxu0 %v5870_v36  ;;  %v5954_v35 = vld [vmem:[#allocation7 + $0x664] ss:$16 sps:$4 sm:$0xff]   ;;  %v5952_v36 = vld [vmem:[#allocation7 + $0x660] ss:$16 sps:$4 sm:$0xff]  }
 0x847   : > { %4292 = vmatprep.subr.bf16.mxu1 %v5873_v40  ;;  %v5955_v40 = vld [vmem:[#allocation7 + $0x668] ss:$16 sps:$4 sm:$0xff]  }
 0x849   : > { %4121 = vmatpush1.bf16.msra.mxu0 %v5868_v52  ;;  %v5960_v52 = vld [vmem:[#allocation7 + $0x684] ss:$16 sps:$4 sm:$0xff]  }
 0x84a   : > { %4293 = vmatpush1.bf16.msra.mxu1 %v5871_v47  ;;  %4122 = vmatprep.subr.bf16.mxu0 %v5876_v58  ;;  %v5963_v47 = vld [vmem:[#allocation7 + $0x68c] ss:$16 sps:$4 sm:$0xff]   ;;  %v5961_v58 = vld [vmem:[#allocation7 + $0x688] ss:$16 sps:$4 sm:$0xff]  }
 0x84b   : > { %4294 = vmatprep.subr.bf16.mxu1 %v5879_v14  ;;  %v5966_v14 = vld [vmem:[#allocation7 + $0x6a4] ss:$16 sps:$4 sm:$0xff]  }
 0x84d   : > { %4123 = vmatpush1.bf16.msra.mxu0 %v5874_v18  ;;  %v5969_v18 = vld [vmem:[#allocation7 + $0x6ac] ss:$16 sps:$4 sm:$0xff]  }
 0x84e   : > { %4295 = vmatpush1.bf16.msra.mxu1 %v5877_v1  ;;  %4124 = vmatprep.subr.bf16.mxu0 %v5882_v50  ;;  %v5964_v1 = vld [vmem:[#allocation7 + $0x6a0] ss:$16 sps:$4 sm:$0xff]   ;;  %v5967_v50 = vld [vmem:[#allocation7 + $0x6a8] ss:$16 sps:$4 sm:$0xff]  }
 0x84f   : > { %4296 = vmatprep.subr.bf16.mxu1 %v5885_v51  ;;  %v5972_v51 = vld [vmem:[#allocation7 + $0x6c4] ss:$16 sps:$4 sm:$0xff]  }
 0x851   : > { %4125 = vmatpush1.bf16.msra.mxu0 %v5880_v56  ;;  %v5975_v56 = vld [vmem:[#allocation7 + $0x6cc] ss:$16 sps:$4 sm:$0xff]  }
 0x852   : > { %4297 = vmatpush1.bf16.msra.mxu1 %v5883_v63  ;;  %4126 = vmatprep.subr.bf16.mxu0 %v5888_v21  ;;  %v5970_v63 = vld [vmem:[#allocation7 + $0x6c0] ss:$16 sps:$4 sm:$0xff]   ;;  %v5973_v21 = vld [vmem:[#allocation7 + $0x6c8] ss:$16 sps:$4 sm:$0xff]  }
 0x853   : > { %4298 = vmatprep.subr.bf16.mxu1 %v5891_v25  ;;  %v5978_v25 = vld [vmem:[#allocation7 + $0x6e4] ss:$16 sps:$4 sm:$0xff]  }
 0x855   : > { %4127 = vmatpush1.bf16.msra.mxu0 %v5886_v22  ;;  %v5981_v22 = vld [vmem:[#allocation7 + $0x6ec] ss:$16 sps:$4 sm:$0xff]  }
 0x856   : > { %4299 = vmatpush1.bf16.msra.mxu1 %v5889_v37  ;;  %4128 = vmatprep.subr.bf16.mxu0 %v5894_v23  ;;  %v5976_v37 = vld [vmem:[#allocation7 + $0x6e0] ss:$16 sps:$4 sm:$0xff]   ;;  %v5979_v23 = vld [vmem:[#allocation7 + $0x6e8] ss:$16 sps:$4 sm:$0xff]  }
 0x857   : > { %4300 = vmatprep.subr.bf16.mxu1 %v5897_v24  ;;  %v5984_v24 = vld [vmem:[#allocation7 + $0x704] ss:$16 sps:$4 sm:$0xff]  }
 0x859   : > { %4129 = vmatpush1.bf16.msra.mxu0 %v5892_v26  ;;  %v5987_v26 = vld [vmem:[#allocation7 + $0x70c] ss:$16 sps:$4 sm:$0xff]  }
 0x85a   : > { %4301 = vmatpush1.bf16.msra.mxu1 %v5895_v27  ;;  %4130 = vmatprep.subr.bf16.mxu0 %v5900_v28  ;;  %v5982_v27 = vld [vmem:[#allocation7 + $0x700] ss:$16 sps:$4 sm:$0xff]   ;;  %v5985_v28 = vld [vmem:[#allocation7 + $0x708] ss:$16 sps:$4 sm:$0xff]  }
 0x85b   : > { %4302 = vmatprep.subr.bf16.mxu1 %v5903_v29  ;;  %v5990_v29 = vld [vmem:[#allocation7 + $0x724] ss:$16 sps:$4 sm:$0xff]  }
 0x85d   : > { %4131 = vmatpush1.bf16.msra.mxu0 %v5898_v30  ;;  %v5993_v30 = vld [vmem:[#allocation7 + $0x72c] ss:$16 sps:$4 sm:$0xff]  }
 0x85e   : > { %4303 = vmatpush1.bf16.msra.mxu1 %v5901_v31  ;;  %4132 = vmatprep.subr.bf16.mxu0 %v5906_v32  ;;  %v5988_v31 = vld [vmem:[#allocation7 + $0x720] ss:$16 sps:$4 sm:$0xff]   ;;  %v5991_v32 = vld [vmem:[#allocation7 + $0x728] ss:$16 sps:$4 sm:$0xff]  }
 0x85f   : > { %4304 = vmatprep.subr.bf16.mxu1 %v5909_v38  ;;  %v5996_v38 = vld [vmem:[#allocation7 + $0x744] ss:$16 sps:$4 sm:$0xff]  }
 0x861   : > { %4133 = vmatpush1.bf16.msra.mxu0 %v5904_v55  ;;  %v5999_v55 = vld [vmem:[#allocation7 + $0x74c] ss:$16 sps:$4 sm:$0xff]  }
 0x862   : > { %4305 = vmatpush1.bf16.msra.mxu1 %v5907_v57  ;;  %4134 = vmatprep.subr.bf16.mxu0 %v5912_v59  ;;  %v5994_v57 = vld [vmem:[#allocation7 + $0x740] ss:$16 sps:$4 sm:$0xff]   ;;  %v5997_v59 = vld [vmem:[#allocation7 + $0x748] ss:$16 sps:$4 sm:$0xff]  }
 0x863   : > { %4306 = vmatprep.subr.bf16.mxu1 %v5915_v60  ;;  %v6002_v60 = vld [vmem:[#allocation7 + $0x764] ss:$16 sps:$4 sm:$0xff]  }
 0x865   : > { %4135 = vmatpush1.bf16.msra.mxu0 %v5910_v61  ;;  %v6005_v61 = vld [vmem:[#allocation7 + $0x76c] ss:$16 sps:$4 sm:$0xff]  }
 0x866   : > { %4307 = vmatpush1.bf16.msra.mxu1 %v5913_v62  ;;  %4136 = vmatprep.subr.bf16.mxu0 %v5918_v15  ;;  %v6000_v62 = vld [vmem:[#allocation7 + $0x760] ss:$16 sps:$4 sm:$0xff]   ;;  %v6003_v15 = vld [vmem:[#allocation7 + $0x768] ss:$16 sps:$4 sm:$0xff]  }
 0x867   : > { %4308 = vmatprep.subr.bf16.mxu1 %v5921_v39  ;;  %v6008_v39 = vld [vmem:[#allocation7 + $0x784] ss:$16 sps:$4 sm:$0xff]  }
 0x869   : > { %4137 = vmatpush1.bf16.msra.mxu0 %v5916_v41  ;;  %v6011_v41 = vld [vmem:[#allocation7 + $0x78c] ss:$16 sps:$4 sm:$0xff]  }
 0x86a   : > { %4309 = vmatpush1.bf16.msra.mxu1 %v5919_v42  ;;  %4138 = vmatprep.subr.bf16.mxu0 %v5924_v7  ;;  %v6006_v42 = vld [vmem:[#allocation7 + $0x780] ss:$16 sps:$4 sm:$0xff]   ;;  %v6009_v7 = vld [vmem:[#allocation7 + $0x788] ss:$16 sps:$4 sm:$0xff]  }
 0x86b   : > { %4310 = vmatprep.subr.bf16.mxu1 %v5927_v43  ;;  %v6014_v43 = vld [vmem:[#allocation7 + $0x7a4] ss:$16 sps:$4 sm:$0xff]  }
 0x86d   : > { %4139 = vmatpush1.bf16.msra.mxu0 %v5922_v44  ;;  %v6017_v44 = vld [vmem:[#allocation7 + $0x7ac] ss:$16 sps:$4 sm:$0xff]  }
 0x86e   : > { %4311 = vmatpush1.bf16.msra.mxu1 %v5925_v46  ;;  %4140 = vmatprep.subr.bf16.mxu0 %v5930_v48  ;;  %v6012_v46 = vld [vmem:[#allocation7 + $0x7a0] ss:$16 sps:$4 sm:$0xff]   ;;  %v6015_v48 = vld [vmem:[#allocation7 + $0x7a8] ss:$16 sps:$4 sm:$0xff]  }
 0x86f   : > { %4312 = vmatprep.subr.bf16.mxu1 %v5933_v2  ;;  %v6020_v2 = vld [vmem:[#allocation7 + $0x7c4] ss:$16 sps:$4 sm:$0xff]  }
 0x871   : > { %4141 = vmatpush1.bf16.msra.mxu0 %v5928_v12  ;;  %v6023_v12 = vld [vmem:[#allocation7 + $0x7cc] ss:$16 sps:$4 sm:$0xff]  }
 0x872   : > { %4313 = vmatpush1.bf16.msra.mxu1 %v5931_v3  ;;  %4153 = vmatprep.subr.bf16.mxu0 %v5936_v4  ;;  %v6018_v3 = vld [vmem:[#allocation7 + $0x7c0] ss:$16 sps:$4 sm:$0xff]   ;;  %v6021_v4 = vld [vmem:[#allocation7 + $0x7c8] ss:$16 sps:$4 sm:$0xff]  }
 0x873   : > { %4325 = vmatprep.subr.bf16.mxu1 %v5939_v16  ;;  %v6026_v16 = vld [vmem:[#allocation7 + $0x7e4] ss:$16 sps:$4 sm:$0xff]  }
 0x874   : > { %4143 = vmatmul.mubr.bf16.vlgmr.msra.gmra.mrb[32].mxu0 %v6898_v19 }
 0x875   : > { %4315 = vmatmul.mubr.bf16.vlgmr.msra.gmra.mrb[24].mxu1 %v6898_v19  ;;  %4154 = vmatpush1.bf16.msra.mxu0 %v5934_v5  ;;  %v5957_v19 = vld [vmem:[#allocation7 + $0x66c] ss:$16 sps:$4 sm:$0xff]  }
 0x876   : > { %4185 = vmatprep.mubr.bf16.mxu0 %v6904_v53  ;;  %4326 = vmatpush1.bf16.msra.mxu1 %v5937_v6  ;;  %v6029_v5 = vld [vmem:[#allocation7 + $0x7ec] ss:$16 sps:$4 sm:$0xff]   ;;  %v6024_v6 = vld [vmem:[#allocation7 + $0x7e0] ss:$16 sps:$4 sm:$0xff]  }
 0x877   : > { %4357 = vmatprep.mubr.bf16.mxu1 %v6904_v53  ;;  %4155 = vmatprep.subr.bf16.mxu0 %v5942_v45  ;;  %v5958_v53 = vld [vmem:[#allocation7 + $0x680] ss:$16 sps:$4 sm:$0xff]   ;;  %v6027_v45 = vld [vmem:[#allocation7 + $0x7e8] ss:$16 sps:$4 sm:$0xff]  }
 0x878   : > { %4327 = vmatprep.subr.bf16.mxu1 %v5945_v8  ;;  %v6030_v8 = vld [vmem:[#allocation9 + $0x40] sm:$0xff]  }
 0x879   : > { %4156 = vmatpush1.bf16.msra.mxu0 %v5940_v54  ;;  %v6031_v54 = vld [vmem:[#allocation9 + $0xc0] sm:$0xff]  }
 0x87a   : > { %4328 = vmatpush1.bf16.msra.mxu1 %v5943_v9  ;;  %4157 = vmatprep.subr.bf16.mxu0 %v5948_v10  ;;  %v6032_v9 = vld [vmem:[#allocation9] sm:$0xff]  }
 0x87b   : > { %4329 = vmatprep.subr.bf16.mxu1 %v5951_v11  ;;  %v6033_v10 = vld [vmem:[#allocation9 + $0x80] sm:$0xff]   ;;  %v6034_v11 = vld [vmem:[#allocation9 + $0x48] sm:$0xff]  }
 0x87d   : > { %4158 = vmatpush1.bf16.msra.mxu0 %v5946_v13  ;;  %v6035_v13 = vld [vmem:[#allocation9 + $0xc8] sm:$0xff]  }
 0x87e   : > { %4330 = vmatpush1.bf16.msra.mxu1 %v5949_v34  ;;  %4159 = vmatprep.subr.bf16.mxu0 %v5954_v35  ;;  %v6036_v34 = vld [vmem:[#allocation9 + $0x8] sm:$0xff]  }
 0x87f   : > { %4331 = vmatprep.subr.bf16.mxu1 %v5957_v19  ;;  %v6037_v35 = vld [vmem:[#allocation9 + $0x88] sm:$0xff]   ;;  %v6038_v19 = vld [vmem:[#allocation9 + $0x50] sm:$0xff]  }
 0x881   : > { %4160 = vmatpush1.bf16.msra.mxu0 %v5952_v36  ;;  %v6039_v36 = vld [vmem:[#allocation9 + $0xd0] sm:$0xff]  }
 0x882   : > { %4332 = vmatpush1.bf16.msra.mxu1 %v5955_v40  ;;  %4161 = vmatprep.subr.bf16.mxu0 %v5960_v52  ;;  %v6040_v40 = vld [vmem:[#allocation9 + $0x10] sm:$0xff]  }
 0x883   : > { %4333 = vmatprep.subr.bf16.mxu1 %v5963_v47  ;;  %v6041_v52 = vld [vmem:[#allocation9 + $0x90] sm:$0xff]   ;;  %v6042_v47 = vld [vmem:[#allocation9 + $0x58] sm:$0xff]  }
 0x885   : > { %4162 = vmatpush1.bf16.msra.mxu0 %v5958_v53  ;;  %v6043_v53 = vld [vmem:[#allocation9 + $0xd8] sm:$0xff]  }
 0x886   : > { %4334 = vmatpush1.bf16.msra.mxu1 %v5961_v58  ;;  %4163 = vmatprep.subr.bf16.mxu0 %v5966_v14  ;;  %v6044_v58 = vld [vmem:[#allocation9 + $0x18] sm:$0xff]   ;;  %v6046_v14 = vld [vmem:[#allocation9 + $0x60] sm:$0xff]  }
 0x887   : > { %4335 = vmatprep.subr.bf16.mxu1 %v5969_v18  ;;  %v6047_v18 = vld [vmem:[#allocation9 + $0xe0] sm:$0xff]  }
 0x889   : > { %4164 = vmatpush1.bf16.msra.mxu0 %v5964_v1  ;;  %v6048_v1 = vld [vmem:[#allocation9 + $0x20] sm:$0xff]  }
 0x88a   : > { %4336 = vmatpush1.bf16.msra.mxu1 %v5967_v50  ;;  %4165 = vmatprep.subr.bf16.mxu0 %v5972_v51  ;;  %v6049_v50 = vld [vmem:[#allocation9 + $0xa0] sm:$0xff]   ;;  %v6050_v51 = vld [vmem:[#allocation9 + $0x68] sm:$0xff]  }
 0x88b   : > { %4337 = vmatprep.subr.bf16.mxu1 %v5975_v56  ;;  %v6051_v56 = vld [vmem:[#allocation9 + $0xe8] sm:$0xff]  }
 0x88d   : > { %4166 = vmatpush1.bf16.msra.mxu0 %v5970_v63  ;;  %v6052_v63 = vld [vmem:[#allocation9 + $0x28] sm:$0xff]  }
 0x88e   : > { %4338 = vmatpush1.bf16.msra.mxu1 %v5973_v21  ;;  %4167 = vmatprep.subr.bf16.mxu0 %v5978_v25  ;;  %v6053_v21 = vld [vmem:[#allocation9 + $0xa8] sm:$0xff]   ;;  %v6054_v25 = vld [vmem:[#allocation9 + $0x70] sm:$0xff]  }
 0x88f   : > { %4339 = vmatprep.subr.bf16.mxu1 %v5981_v22  ;;  %v6055_v22 = vld [vmem:[#allocation9 + $0xf0] sm:$0xff]  }
 0x891   : > { %4168 = vmatpush1.bf16.msra.mxu0 %v5976_v37  ;;  %v6056_v37 = vld [vmem:[#allocation9 + $0x30] sm:$0xff]  }
 0x892   : > { %4340 = vmatpush1.bf16.msra.mxu1 %v5979_v23  ;;  %4169 = vmatprep.subr.bf16.mxu0 %v5984_v24  ;;  %v6057_v23 = vld [vmem:[#allocation9 + $0xb0] sm:$0xff]   ;;  %v6058_v24 = vld [vmem:[#allocation9 + $0x78] sm:$0xff]  }
 0x893   : > { %4341 = vmatprep.subr.bf16.mxu1 %v5987_v26  ;;  %v6059_v26 = vld [vmem:[#allocation9 + $0xf8] sm:$0xff]  }
 0x895   : > { %4170 = vmatpush1.bf16.msra.mxu0 %v5982_v27  ;;  %v6060_v27 = vld [vmem:[#allocation9 + $0x38] sm:$0xff]  }
 0x896   : > { %4342 = vmatpush1.bf16.msra.mxu1 %v5985_v28  ;;  %4171 = vmatprep.subr.bf16.mxu0 %v5990_v29  ;;  %v6061_v28 = vld [vmem:[#allocation9 + $0xb8] sm:$0xff]   ;;  %v2722_v29 = vld [vmem:[%s6968_s24] sm:$0xf] }
 0x897   : > { %4343 = vmatprep.subr.bf16.mxu1 %v5993_v30  ;;  %v2727_v30 = vrot.slane %v2722_v29, %v6682_v17 }
 0x899   : > { %4172 = vmatpush1.bf16.msra.mxu0 %v5988_v31 }
 0x89a   : > { %4344 = vmatpush1.bf16.msra.mxu1 %v5991_v32  ;;  %4173 = vmatprep.subr.bf16.mxu0 %v5996_v38  ;;  %v2735_v32 = vrot.slane %v2722_v29, %v6703_v33  ;;  %v2731_v38 = vrot.slane %v2722_v29, %v6792_v0 }
 0x89b   : > { %4345 = vmatprep.subr.bf16.mxu1 %v5999_v55 }
 0x89d   : > { %4174 = vmatpush1.bf16.msra.mxu0 %v5994_v57 }
 0x89e   : > { %4346 = vmatpush1.bf16.msra.mxu1 %v5997_v59  ;;  %4175 = vmatprep.subr.bf16.mxu0 %v6002_v60  ;;  %v2739_v59 = vrot.slane %v2722_v29, %v6694_v20 }
 0x89f   : > { %4347 = vmatprep.subr.bf16.mxu1 %v6005_v61 }
 0x8a1   : > { %4176 = vmatpush1.bf16.msra.mxu0 %v6000_v62 }
 0x8a2   : > { %4348 = vmatpush1.bf16.msra.mxu1 %v6003_v15  ;;  %4177 = vmatprep.subr.bf16.mxu0 %v6008_v39 }
 0x8a3   : > { %4349 = vmatprep.subr.bf16.mxu1 %v6011_v41 }
 0x8a5   : > { %4178 = vmatpush1.bf16.msra.mxu0 %v6006_v42 }
 0x8a6   : > { %4350 = vmatpush1.bf16.msra.mxu1 %v6009_v7  ;;  %4179 = vmatprep.subr.bf16.mxu0 %v6014_v43 }
 0x8a7   : > { %4351 = vmatprep.subr.bf16.mxu1 %v6017_v44 }
 0x8a9   : > { %4180 = vmatpush1.bf16.msra.mxu0 %v6012_v46 }
 0x8aa   : > { %4352 = vmatpush1.bf16.msra.mxu1 %v6015_v48  ;;  %4181 = vmatprep.subr.bf16.mxu0 %v6020_v2 }
 0x8ab   : > { %4353 = vmatprep.subr.bf16.mxu1 %v6023_v12 }
 0x8ad   : > { %4182 = vmatpush1.bf16.msra.mxu0 %v6018_v3 }
 0x8ae   : > { %4354 = vmatpush1.bf16.msra.mxu1 %v6021_v4  ;;  %4183 = vmatprep.subr.bf16.mxu0 %v6026_v16  ;;  %v5306_v4 = vld [vmem:[%s6969_s12] ss:$0 sm:$0xff] }
 0x8af   : > { %4355 = vmatprep.subr.bf16.mxu1 %v6029_v5 }
 0x8b1   : > { %4184 = vmatpush1.bf16.msra.mxu0 %v6024_v6 }
 0x8b2   : > { %4356 = vmatpush1.bf16.msra.mxu1 %v6027_v45  ;;  %5357 = vmatprep.subr.bf16.mxu0 %v6030_v8 }
 0x8b3   : > { %5379 = vmatprep.subr.bf16.mxu1 %v6031_v54 }
 0x8b4   : > { %4186 = vmatmul.mubr.bf16.vlgmr.msra.gmra.mrb[32].mxu0 %v6900_v49 }
 0x8b5   : > { %4358 = vmatmul.mubr.bf16.vlgmr.msra.gmra.mrb[24].mxu1 %v6900_v49  ;;  %5358 = vmatpush3.bf16.msra.mxu0 %v6032_v9  ;;  %v6045_v49 = vld [vmem:[#allocation9 + $0x98] sm:$0xff]  }
 0x8b6   : > { %5380 = vmatpush3.bf16.msra.mxu1 %v6033_v10  ;;  %5359 = vmatprep.subr.bf16.mxu0 %v6034_v11 }
 0x8b7   : > { %5381 = vmatprep.subr.bf16.mxu1 %v6035_v13 }
 0x8b9   : > { %5360 = vmatpush3.bf16.msra.mxu0 %v6036_v34 }
 0x8ba   : > { %5382 = vmatpush3.bf16.msra.mxu1 %v6037_v35  ;;  %5361 = vmatprep.subr.bf16.mxu0 %v6038_v19 }
 0x8bb   : > { %5383 = vmatprep.subr.bf16.mxu1 %v6039_v36 }
 0x8bd   : > { %5362 = vmatpush3.bf16.msra.mxu0 %v6040_v40 }
 0x8be   : > { %5384 = vmatpush3.bf16.msra.mxu1 %v6041_v52  ;;  %5363 = vmatprep.subr.bf16.mxu0 %v6042_v47 }
 0x8bf   : > { %5385 = vmatprep.subr.bf16.mxu1 %v6043_v53 }
 0x8c1   : > { %5364 = vmatpush3.bf16.msra.mxu0 %v6044_v58 }
 0x8c2   : > { %5386 = vmatpush3.bf16.msra.mxu1 %v6045_v49  ;;  %5365 = vmatprep.subr.bf16.mxu0 %v6046_v14 }
 0x8c3   : > { %5387 = vmatprep.subr.bf16.mxu1 %v6047_v18 }
 0x8c5   : > { %5366 = vmatpush3.bf16.msra.mxu0 %v6048_v1 }
 0x8c6   : > { %5388 = vmatpush3.bf16.msra.mxu1 %v6049_v50  ;;  %5367 = vmatprep.subr.bf16.mxu0 %v6050_v51 }
 0x8c7   : > { %5389 = vmatprep.subr.bf16.mxu1 %v6051_v56 }
 0x8c9   : > { %5368 = vmatpush3.bf16.msra.mxu0 %v6052_v63 }
 0x8ca   : > { %5390 = vmatpush3.bf16.msra.mxu1 %v6053_v21  ;;  %5369 = vmatprep.subr.bf16.mxu0 %v6054_v25 }
 0x8cb   : > { %5391 = vmatprep.subr.bf16.mxu1 %v6055_v22 }
 0x8cd   : > { %5370 = vmatpush3.bf16.msra.mxu0 %v6056_v37 }
 0x8ce   : > { %5392 = vmatpush3.bf16.msra.mxu1 %v6057_v23  ;;  %5371 = vmatprep.subr.bf16.mxu0 %v6058_v24 }
 0x8cf   : > { %5393 = vmatprep.subr.bf16.mxu1 %v6059_v26 }
 0x8d1   : > { %5372 = vmatpush3.bf16.msra.mxu0 %v6060_v27 }
 0x8d2   : > { %5394 = vmatpush3.bf16.msra.mxu1 %v6061_v28 }
 0x987   : > { %v4187_v31 = vpop.f32.mrb[32].mxu0 }
 0x988   : > { %v4359_v55 = vpop.f32.mrb[24].mxu1  ;;  %v4189_v57 = vpop.f32.mrb[33].mxu0  ;;  %v5439_v62 = vadd.f32 %v4187_v31, %v2727_v30 }
 0x989   : > { %v4361_v60 = vpop.f32.mrb[25].mxu1  ;;  %v4191_v61 = vpop.f32.mrb[34].mxu0  ;;  %v5443_v42 = vadd.f32 %v4359_v55, %v2735_v32  ;;  %v5440_v7 = vadd.f32 %v4189_v57, %v2731_v38 }
 0x98a   : > { %v5441_v15 = vadd.f32 %v4191_v61, %v2727_v30  ;;  %v4363_v39 = vpop.f32.mrb[26].mxu1  ;;  %v4193_v41 = vpop.f32.mrb[35].mxu0  ;;  %v5444_v46 = vadd.f32 %v4361_v60, %v2739_v59 }
 0x98b   : > { %v5445_v43 = vadd.f32 %v4363_v39, %v2735_v32  ;;  %v5442_v44 = vadd.f32 %v4193_v41, %v2731_v38  ;;  %v4365_v17 = vpop.f32.mrb[27].mxu1 }
 0x98c   : > { %v4368_v33 = vpack.c.bf16 %v5441_v15, %v5439_v62  ;;  %v5446_v48 = vadd.f32 %v4365_v17, %v2739_v59 }
 0x98d   : > { %v4370_v0 = vpack.c.bf16 %v5445_v43, %v5443_v42  ;;  %v4369_v2 = vpack.c.bf16 %v5442_v44, %v5440_v7 }
 0x98e   : > { %v4371_v12 = vpack.c.bf16 %v5446_v48, %v5444_v46 }
 0x98f   : > { %4667 = vmatprep.mubr.bf16.mxu0 %v4369_v2 }
 0x990   : > { %4708 = vmatprep.mubr.bf16.mxu1 %v4371_v12  ;;  %4668 = vmatmul.mubr.bf16.vlgmr.msra.gmra.mrb[36].mxu0 %v4368_v33 }
 0x991   : > { %4709 = vmatmul.mubr.bf16.vlgmr.msra.gmra.mrb[28].mxu1 %v4370_v0 }
 0xa63   : > { %v5373_v20 = vpop.f32.mrb[36].mxu0 }
 0xa64   : > { %v5395_v3 = vpop.f32.mrb[28].mxu1  ;;  %v5374_v16 = vpop.f32.mrb[37].mxu0 }
 0xa65   : > { %v5375_v5 = vadd.f32 %v5374_v16, %v5373_v20  ;;  %v5396_v6 = vpop.f32.mrb[29].mxu1  ;;  %v5376_v45 = vpop.f32.mrb[38].mxu0 }
 0xa66   : > { %v5397_v8 = vadd.f32 %v5396_v6, %v5395_v3  ;;  %v5398_v54 = vpop.f32.mrb[30].mxu1  ;;  %v5377_v9 = vpop.f32.mrb[39].mxu0 }
 0xa67   : > { %v4670_v10 = vadd.f32 %v5375_v5, %v5306_v4  ;;  %v5378_v11 = vadd.f32 %v5377_v9, %v5376_v45  ;;  %v5399_v13 = vpop.f32.mrb[31].mxu1 }
 0xa68   : > { %v5400_v34 = vadd.f32 %v5399_v13, %v5398_v54 }
 0xa69   : > { %v4711_v35 = vadd.f32 %v5397_v8, %v4670_v10  ;;  %v4673_v19 = vadd.f32 %v5378_v11, %v5306_v4 }
 0xa6b   : > { %4717 = vst [vmem:[%s589_s26] sm:$0xff] %v4711_v35  ;;  %v4714_v36 = vadd.f32 %v5400_v34, %v4673_v19 }
 0xa6d   : > { %4718 = vst [vmem:[%s589_s26 + $0x8] sm:$0xff] %v4714_v36 }
 0xa6e PF: > { %s6971_s18 = sld [smem:[#allocation13_spill]] }
 0xa74   : > { %s28_s18 = sadd.s32 1, %s6971_s18  }
 0xa75   : > { %p25_p8 = scmp.ge.s32.totalorder %s28_s18, 4  }
 0xa77   :  { %27 = sbr.rel (!%p25_p8) target bundleno = 8 (0x8), region = 134 }
 0xa7e   :  { %4741 = vsyncpa [#allocation3], 1 }
 0xa7f   :  { %4743 = vsyncpa [#allocation3 + $0x1], 1 }
 0xa80   :  { %4744 = vsyncpa [#allocation5], 1 }
 0xa81   :  { %4745 = vsyncpa [#allocation8], 1 }

</bundles_post_ra>
